<compile_context>
chip_gen: v5e
topology: v5e:2x2
jax: 0.10.0
libtpu: 0.0.40
codegen_flags: <defaults>
</compile_context>

<pallas_src>
import functools
import math

import jax
import jax.numpy as jnp
from jax import lax
from jax.experimental import pallas as pl
from jax.experimental.pallas import tpu as pltpu

LANE = 128
SUBLANE = 8


def _round_up(x, m):
    return ((x + m - 1) // m) * m


def _vmem_limit_bytes(estimate):
    # 2x headroom for double-buffering / compiler temporaries, clamped to a
    # range valid on v5e/v6e (128 MiB physical) and v7x (64 MiB physical).
    return int(min(48 * 2**20, max(16 * 2**20, 2 * estimate)))


# ---------------------------------------------------------------------------
# Kernel A: depthwise message-passing conv.
#   grid: edge tiles ("arbitrary" reduction axis).
#   outputs: per-edge messages (lane-dense tiles) and the aggregated conv
#            result, kept VMEM-resident as an accumulator across edge tiles.
# ---------------------------------------------------------------------------
def _conv_kernel(
    src_sm,     # [Epad]      i32 SMEM (scalar prefetch)  edge source nodes
    dst_sm,     # [Epad]      i32 SMEM (scalar prefetch)  edge destination nodes
    x_ref,      # [Npad, Cp]  f32 VMEM  all node features (resident block)
    attr_ref,   # [tE, A]     f32 VMEM  edge attributes for this edge tile
    kw_ref,     # [A, Cp]     f32 VMEM  conv kernel weight
    kb_ref,     # [1, Cp]     f32 VMEM  conv output bias
    msg_ref,    # [tE, Cp]    f32 VMEM  OUT: per-edge messages
    xconv_ref,  # [Npad, Cp]  f32 VMEM  OUT: aggregated conv output (accumulator)
    xs_ref,     # [tE, Cp]    f32 VMEM  scratch: gathered x[src]
    *,
    tile_e,
):
    step = pl.program_id(0)
    base = step * tile_e
    unroll = tile_e <= 64

    # Initialize the resident accumulator with the conv bias on the first tile.
    @pl.when(step == 0)
    def _():
        xconv_ref[...] = jnp.broadcast_to(kb_ref[...], xconv_ref.shape)

    # Per-edge kernel from edge attributes (MXU, lane-dense output of 128).
    k = jnp.dot(attr_ref[...], kw_ref[...], preferred_element_type=jnp.float32)

    # Direct gather of x[src]: dynamic VMEM row loads (no [E, N] one-hot).
    def gather_body(i, carry):
        s = src_sm[base + i]
        xs_ref[pl.ds(i, 1), :] = x_ref[pl.ds(s, 1), :]
        return carry

    lax.fori_loop(0, tile_e, gather_body, 0, unroll=unroll)

    messages = xs_ref[...] * k
    msg_ref[...] = messages

    # Direct scatter-add into the resident accumulator (no [N, E] one-hot).
    def scatter_body(i, carry):
        d = dst_sm[base + i]
        xconv_ref[pl.ds(d, 1), :] = (
            xconv_ref[pl.ds(d, 1), :] + msg_ref[pl.ds(i, 1), :]
        )
        return carry

    lax.fori_loop(0, tile_e, scatter_body, 0, unroll=unroll)


# ---------------------------------------------------------------------------
# Kernel B: LayerNorm -> Linear -> GELU -> Linear -> layer_scale -> residual.
#   grid: node tiles ("parallel" axis -> megacore on v7x), lane-dense Cp=128.
# ---------------------------------------------------------------------------
def _mlp_kernel(
    xconv_ref,  # [tN, Cp]  conv output tile
    xres_ref,   # [tN, Cp]  residual input tile (aliased with out)
    gamma_ref,  # [1, Cp]
    beta_ref,   # [1, Cp]
    w1_ref,     # [Cp, Hp]
    b1_ref,     # [1, Hp]
    w2_ref,     # [Hp, Cp]
    b2_ref,     # [1, Cp]
    ls_ref,     # [1, Cp]
    out_ref,    # [tN, Cp]
    *,
    channels,
):
    xc = xconv_ref[...]
    cpad = xc.shape[-1]

    # LayerNorm over the *real* channels only (padded lanes hold zeros).
    lane = lax.broadcasted_iota(jnp.int32, (1, cpad), 1)
    cmask = (lane < channels).astype(jnp.float32)
    inv_c = 1.0 / float(channels)
    mean = jnp.sum(xc * cmask, axis=-1, keepdims=True) * inv_c
    diff = (xc - mean) * cmask
    var = jnp.sum(diff * diff, axis=-1, keepdims=True) * inv_c
    xn = diff * lax.rsqrt(var + 1e-5)
    xn = xn * gamma_ref[...] + beta_ref[...]

    # MLP: linear_1 -> exact (erf) GELU (torch.nn.GELU()) -> linear_2.
    h = jnp.dot(xn, w1_ref[...], preferred_element_type=jnp.float32) + b1_ref[...]
    h = 0.5 * h * (1.0 + lax.erf(h * (1.0 / math.sqrt(2.0))))
    y = jnp.dot(h, w2_ref[...], preferred_element_type=jnp.float32) + b2_ref[...]

    # layer_scale + residual (input.shape == x.shape here).
    out_ref[...] = y * ls_ref[...] + xres_ref[...]


# ---------------------------------------------------------------------------
# Wrapper
# ---------------------------------------------------------------------------
def convnext_forward(x, edge_index, edge_attr, params, *, tile_n=256, tile_e=512):
    """ConvNext forward. Returns (out [N, C], messages [E, C])."""
    f32 = jnp.float32
    n, c = x.shape
    e, a = edge_attr.shape
    h = params["w1"].shape[1]

    cp = _round_up(c, LANE)        # lane-dense channel dim
    hp = _round_up(h, LANE)        # lane-dense hidden dim

    tile_n = _round_up(min(tile_n, n), SUBLANE)
    tile_e = _round_up(min(tile_e, e), SUBLANE)
    npad = _round_up(n, tile_n)
    epad = _round_up(e, tile_e)

    # --- zero-pad inputs / parameters to lane-dense shapes (padding is inert:
    #     padded edges have attr == 0 -> zero messages; padded channels stay 0).
    x_pad = jnp.zeros((npad, cp), f32).at[:n, :c].set(x.astype(f32))
    attr_pad = jnp.zeros((epad, a), f32).at[:e, :].set(edge_attr.astype(f32))
    src = jnp.zeros((epad,), jnp.int32).at[:e].set(edge_index[0].astype(jnp.int32))
    dst = jnp.zeros((epad,), jnp.int32).at[:e].set(edge_index[1].astype(jnp.int32))

    def pad_mat(w, rows, cols):
        return jnp.zeros((rows, cols), f32).at[: w.shape[0], : w.shape[1]].set(
            w.astype(f32))

    def pad_row(v, cols):
        v = jnp.asarray(v, f32).reshape(1, -1)
        return jnp.zeros((1, cols), f32).at[:, : v.shape[1]].set(v)

    kw = pad_mat(params["kernel_w"], a, cp)
    kb = pad_row(params["kernel_b"], cp)
    gamma = pad_row(params["ln_gamma"], cp)
    beta = pad_row(params["ln_beta"], cp)
    w1 = pad_mat(params["w1"], cp, hp)
    b1 = pad_row(params["b1"], hp)
    w2 = pad_mat(params["w2"], hp, cp)
    b2 = pad_row(params["b2"], cp)
    ls = pad_row(params["layer_scale"], cp)

    # ---------------- Kernel A: conv / message passing ----------------------
    est_a = 4 * (
        2 * npad * cp          # resident x + x_conv accumulator
        + 2 * tile_e * a       # attr tile (double-buffered)
        + a * cp + cp          # kernel weight + bias
        + 2 * tile_e * cp      # message tile (double-buffered)
        + tile_e * cp          # gather scratch
    )
    msg_pad, xconv_pad = pl.pallas_call(
        functools.partial(_conv_kernel, tile_e=tile_e),
        out_shape=(
            jax.ShapeDtypeStruct((epad, cp), f32),   # messages
            jax.ShapeDtypeStruct((npad, cp), f32),   # x_conv
        ),
        grid_spec=pltpu.PrefetchScalarGridSpec(
            num_scalar_prefetch=2,                   # src, dst -> SMEM
            grid=(epad // tile_e,),
            in_specs=[
                pl.BlockSpec((npad, cp), lambda t, s, d: (0, 0)),     # x (resident)
                pl.BlockSpec((tile_e, a), lambda t, s, d: (t, 0)),    # attr tile
                pl.BlockSpec((a, cp), lambda t, s, d: (0, 0)),        # kernel weight
                pl.BlockSpec((1, cp), lambda t, s, d: (0, 0)),        # kernel bias
            ],
            out_specs=[
                pl.BlockSpec((tile_e, cp), lambda t, s, d: (t, 0)),   # messages
                pl.BlockSpec((npad, cp), lambda t, s, d: (0, 0)),     # accumulator
            ],
            scratch_shapes=[pltpu.VMEM((tile_e, cp), f32)],
        ),
        compiler_params=pltpu.CompilerParams(
            dimension_semantics=("arbitrary",),
            vmem_limit_bytes=_vmem_limit_bytes(est_a),
        ),
    )(src, dst, x_pad, attr_pad, kw, kb)

    # ---------------- Kernel B: LayerNorm + MLP + layer_scale + residual ----
    est_b = 4 * (
        2 * 3 * tile_n * cp    # x_conv / residual / out tiles (double-buffered)
        + cp * hp + hp * cp    # w1, w2
        + 2 * hp + 6 * cp      # biases, gamma/beta, layer_scale
        + tile_n * hp          # hidden activations
    )
    out_pad = pl.pallas_call(
        functools.partial(_mlp_kernel, channels=c),
        out_shape=jax.ShapeDtypeStruct((npad, cp), f32),
        grid=(npad // tile_n,),
        in_specs=[
            pl.BlockSpec((tile_n, cp), lambda i: (i, 0)),   # x_conv tile
            pl.BlockSpec((tile_n, cp), lambda i: (i, 0)),   # residual tile
            pl.BlockSpec((1, cp), lambda i: (0, 0)),        # gamma
            pl.BlockSpec((1, cp), lambda i: (0, 0)),        # beta
            pl.BlockSpec((cp, hp), lambda i: (0, 0)),       # w1
            pl.BlockSpec((1, hp), lambda i: (0, 0)),        # b1
            pl.BlockSpec((hp, cp), lambda i: (0, 0)),       # w2
            pl.BlockSpec((1, cp), lambda i: (0, 0)),        # b2
            pl.BlockSpec((1, cp), lambda i: (0, 0)),        # layer_scale
        ],
        out_specs=pl.BlockSpec((tile_n, cp), lambda i: (i, 0)),
        input_output_aliases={1: 0},                        # reuse residual buffer
        compiler_params=pltpu.CompilerParams(
            dimension_semantics=("parallel",),
            vmem_limit_bytes=_vmem_limit_bytes(est_b),
        ),
    )(xconv_pad, x_pad, gamma, beta, w1, b1, w2, b2, ls)

    return out_pad[:n, :c], msg_pad[:e, :c]


# ---------------------------------------------------------------------------
# Pure-JAX reference of the same forward pass.
# ---------------------------------------------------------------------------
def convnext_reference(x, edge_index, edge_attr, params):
    hi = jax.lax.Precision.HIGHEST
    src, dst = edge_index[0], edge_index[1]
    k = jnp.dot(edge_attr, params["kernel_w"], precision=hi)
    messages = x[src] * k
    n = x.shape[0]
    x_conv = jnp.zeros((n, x.shape[1]), jnp.float32).at[dst].add(messages)
    x_conv = x_conv + params["kernel_b"][None, :]

    mean = jnp.mean(x_conv, axis=-1, keepdims=True)
    var = jnp.mean((x_conv - mean) ** 2, axis=-1, keepdims=True)
    xn = (x_conv - mean) / jnp.sqrt(var + 1e-5)
    xn = xn * params["ln_gamma"][None, :] + params["ln_beta"][None, :]

    h = jnp.dot(xn, params["w1"], precision=hi) + params["b1"][None, :]
    h = 0.5 * h * (1.0 + jax.scipy.special.erf(h / math.sqrt(2.0)))
    y = jnp.dot(h, params["w2"], precision=hi) + params["b2"][None, :]
    y = y * params["layer_scale"][None, :]
    return y + x, messages


if __name__ == "__main__":
    # Small, ConvNext-consistent shapes.
    N = 16            # nodes
    C = 8             # channels
    A = 4             # edge-attr dim
    E = 32            # edges
    WIDEN = 4         # widening_factor
    H = WIDEN * C

    key = jax.random.PRNGKey(0)
    keys = jax.random.split(key, 10)

    x = jax.random.normal(keys[0], (N, C), jnp.float32)
    edge_index = jax.random.randint(keys[1], (2, E), 0, N, jnp.int32)
    edge_attr = jax.random.normal(keys[2], (E, A), jnp.float32)

    params = {
        # conv: Linear(attr_dim -> channels, bias=False) per-edge kernel + bias
        "kernel_w": jax.random.normal(keys[3], (A, C), jnp.float32) * 0.2,
        "kernel_b": jax.random.normal(keys[4], (C,), jnp.float32) * 0.1,
        # LayerNorm(channels)
        "ln_gamma": jnp.ones((C,), jnp.float32),
        "ln_beta": jnp.zeros((C,), jnp.float32),
        # linear_1: C -> 4C, linear_2: 4C -> C (stored transposed for x @ W)
        "w1": jax.random.normal(keys[5], (C, H), jnp.float32) * 0.2,
        "b1": jax.random.normal(keys[6], (H,), jnp.float32) * 0.1,
        "w2": jax.random.normal(keys[7], (H, C), jnp.float32) * 0.2,
        "b2": jax.random.normal(keys[8], (C,), jnp.float32) * 0.1,
        # layer_scale = ones(channels) * 1e-6
        "layer_scale": jnp.full((C,), 1e-6, jnp.float32),
    }

    # Small tiles so both grids have >1 step at these toy sizes.
    fwd = jax.jit(functools.partial(convnext_forward, tile_n=8, tile_e=16))
    out, messages = fwd(x, edge_index, edge_attr, params)
    out = jax.block_until_ready(out)
    messages = jax.block_until_ready(messages)

    ref_out, ref_msgs = convnext_reference(x, edge_index, edge_attr, params)

    assert out.shape == (N, C) and messages.shape == (E, C)
    assert jnp.allclose(out, ref_out, rtol=1e-4, atol=1e-4), "output mismatch"
    assert jnp.allclose(messages, ref_msgs, rtol=1e-4, atol=1e-4), "messages mismatch"

    print("KERNEL_OK")
</pallas_src>

<mosaic_0001>
module attributes {stable_mosaic.version = 11 : i64} {
  func.func @_conv_kernel(%arg0: i32, %arg1: memref<32xi32, #tpu.memory_space<smem>>, %arg2: memref<32xi32, #tpu.memory_space<smem>>, %arg3: memref<16x128xf32, #tpu.memory_space<vmem>>, %arg4: memref<16x4xf32, #tpu.memory_space<vmem>>, %arg5: memref<4x128xf32, #tpu.memory_space<vmem>>, %arg6: memref<1x128xf32, #tpu.memory_space<vmem>>, %arg7: memref<16x128xf32, #tpu.memory_space<vmem>>, %arg8: memref<16x128xf32, #tpu.memory_space<vmem>>, %arg9: memref<16x128xf32, #tpu.memory_space<vmem>>) attributes {dimension_semantics = [#tpu.dimension_semantics<arbitrary>], iteration_bounds = array<i64: 2>, scalar_prefetch = 2 : i64, scratch_operands = 1 : i64, tpu.core_type = #tpu.core_type<tc>, window_params = [{pipeline_mode = #tpu.pipeline_mode<synchronous>, transform_indices = @transform_0, window_bounds = array<i64: 16, 128>}, {transform_indices = @transform_1, window_bounds = array<i64: 16, 4>}, {pipeline_mode = #tpu.pipeline_mode<synchronous>, transform_indices = @transform_2, window_bounds = array<i64: 4, 128>}, {pipeline_mode = #tpu.pipeline_mode<synchronous>, transform_indices = @transform_3, window_bounds = array<i64: 1, 128>}, {transform_indices = @transform_4, window_bounds = array<i64: 16, 128>}, {pipeline_mode = #tpu.pipeline_mode<synchronous>, transform_indices = @transform_5, window_bounds = array<i64: 16, 128>}]} {
    %c16_i32 = arith.constant 16 : i32
    %0 = arith.muli %arg0, %c16_i32 : i32
    %c0_i32 = arith.constant 0 : i32
    %1 = arith.cmpi eq, %arg0, %c0_i32 : i32
    %2 = arith.extui %1 : i1 to i32
    %c0_i32_0 = arith.constant 0 : i32
    %3 = arith.cmpi ne, %2, %c0_i32_0 : i32
    scf.if %3 {
      %c0_107 = arith.constant 0 : index
      %c0_108 = arith.constant 0 : index
      %282 = vector.load %arg6[%c0_107, %c0_108] : memref<1x128xf32, #tpu.memory_space<vmem>>, vector<1x128xf32>
      %283 = vector.shape_cast %282 : vector<1x128xf32> to vector<1x128xf32>
      %284 = vector.broadcast %283 : vector<1x128xf32> to vector<16x128xf32>
      %c0_109 = arith.constant 0 : index
      %c0_110 = arith.constant 0 : index
      %285 = vector.load %arg8[%c0_109, %c0_110] : memref<16x128xf32, #tpu.memory_space<vmem>>, vector<16x128xf32>
      tpu.vector_store %arg8[%c0_109, %c0_110], %284 {strides = array<i32>} : memref<16x128xf32, #tpu.memory_space<vmem>>, vector<16x128xf32>,
    } else {
    }
    %c0 = arith.constant 0 : index
    %c0_1 = arith.constant 0 : index
    %4 = vector.load %arg4[%c0, %c0_1] : memref<16x4xf32, #tpu.memory_space<vmem>>, vector<16x4xf32>
    %c0_2 = arith.constant 0 : index
    %c0_3 = arith.constant 0 : index
    %5 = vector.load %arg5[%c0_2, %c0_3] : memref<4x128xf32, #tpu.memory_space<vmem>>, vector<4x128xf32>
    %cst = arith.constant dense<0.000000e+00> : vector<16x128xf32>
    %6 = tpu.matmul %4, %5, %cst {dimension_numbers = #tpu.dot_dimension_numbers<[1], [0], [0], [1], [0, 0, 1, 1], [], []>} : vector<16x4xf32>, vector<4x128xf32>, vector<16x128xf32> -> vector<16x128xf32>
    %c0_i32_4 = arith.constant 0 : i32
    %7 = arith.addi %0, %c0_i32_4 : i32
    %8 = arith.index_cast %7 : i32 to index
    %9 = memref.load %arg1[%8] : memref<32xi32, #tpu.memory_space<smem>>
    %10 = arith.index_cast %9 : i32 to index
    %c0_5 = arith.constant 0 : index
    %11 = vector.load %arg3[%10, %c0_5] : memref<16x128xf32, #tpu.memory_space<vmem>>, vector<1x128xf32>
    %12 = arith.index_cast %c0_i32_4 : i32 to index
    %c0_6 = arith.constant 0 : index
    %13 = vector.load %arg9[%12, %c0_6] : memref<16x128xf32, #tpu.memory_space<vmem>>, vector<1x128xf32>
    tpu.vector_store %arg9[%12, %c0_6], %11 {strides = array<i32>} : memref<16x128xf32, #tpu.memory_space<vmem>>, vector<1x128xf32>,
    %c1_i32 = arith.constant 1 : i32
    %14 = arith.addi %0, %c1_i32 : i32
    %15 = arith.index_cast %14 : i32 to index
    %16 = memref.load %arg1[%15] : memref<32xi32, #tpu.memory_space<smem>>
    %17 = arith.index_cast %16 : i32 to index
    %c0_7 = arith.constant 0 : index
    %18 = vector.load %arg3[%17, %c0_7] : memref<16x128xf32, #tpu.memory_space<vmem>>, vector<1x128xf32>
    %19 = arith.index_cast %c1_i32 : i32 to index
    %c0_8 = arith.constant 0 : index
    %20 = vector.load %arg9[%19, %c0_8] : memref<16x128xf32, #tpu.memory_space<vmem>>, vector<1x128xf32>
    tpu.vector_store %arg9[%19, %c0_8], %18 {strides = array<i32>} : memref<16x128xf32, #tpu.memory_space<vmem>>, vector<1x128xf32>,
    %c2_i32 = arith.constant 2 : i32
    %21 = arith.addi %0, %c2_i32 : i32
    %22 = arith.index_cast %21 : i32 to index
    %23 = memref.load %arg1[%22] : memref<32xi32, #tpu.memory_space<smem>>
    %24 = arith.index_cast %23 : i32 to index
    %c0_9 = arith.constant 0 : index
    %25 = vector.load %arg3[%24, %c0_9] : memref<16x128xf32, #tpu.memory_space<vmem>>, vector<1x128xf32>
    %26 = arith.index_cast %c2_i32 : i32 to index
    %c0_10 = arith.constant 0 : index
    %27 = vector.load %arg9[%26, %c0_10] : memref<16x128xf32, #tpu.memory_space<vmem>>, vector<1x128xf32>
    tpu.vector_store %arg9[%26, %c0_10], %25 {strides = array<i32>} : memref<16x128xf32, #tpu.memory_space<vmem>>, vector<1x128xf32>,
    %c3_i32 = arith.constant 3 : i32
    %28 = arith.addi %0, %c3_i32 : i32
    %29 = arith.index_cast %28 : i32 to index
    %30 = memref.load %arg1[%29] : memref<32xi32, #tpu.memory_space<smem>>
    %31 = arith.index_cast %30 : i32 to index
    %c0_11 = arith.constant 0 : index
    %32 = vector.load %arg3[%31, %c0_11] : memref<16x128xf32, #tpu.memory_space<vmem>>, vector<1x128xf32>
    %33 = arith.index_cast %c3_i32 : i32 to index
    %c0_12 = arith.constant 0 : index
    %34 = vector.load %arg9[%33, %c0_12] : memref<16x128xf32, #tpu.memory_space<vmem>>, vector<1x128xf32>
    tpu.vector_store %arg9[%33, %c0_12], %32 {strides = array<i32>} : memref<16x128xf32, #tpu.memory_space<vmem>>, vector<1x128xf32>,
    %c4_i32 = arith.constant 4 : i32
    %35 = arith.addi %0, %c4_i32 : i32
    %36 = arith.index_cast %35 : i32 to index
    %37 = memref.load %arg1[%36] : memref<32xi32, #tpu.memory_space<smem>>
    %38 = arith.index_cast %37 : i32 to index
    %c0_13 = arith.constant 0 : index
    %39 = vector.load %arg3[%38, %c0_13] : memref<16x128xf32, #tpu.memory_space<vmem>>, vector<1x128xf32>
    %40 = arith.index_cast %c4_i32 : i32 to index
    %c0_14 = arith.constant 0 : index
    %41 = vector.load %arg9[%40, %c0_14] : memref<16x128xf32, #tpu.memory_space<vmem>>, vector<1x128xf32>
    tpu.vector_store %arg9[%40, %c0_14], %39 {strides = array<i32>} : memref<16x128xf32, #tpu.memory_space<vmem>>, vector<1x128xf32>,
    %c5_i32 = arith.constant 5 : i32
    %42 = arith.addi %0, %c5_i32 : i32
    %43 = arith.index_cast %42 : i32 to index
    %44 = memref.load %arg1[%43] : memref<32xi32, #tpu.memory_space<smem>>
    %45 = arith.index_cast %44 : i32 to index
    %c0_15 = arith.constant 0 : index
    %46 = vector.load %arg3[%45, %c0_15] : memref<16x128xf32, #tpu.memory_space<vmem>>, vector<1x128xf32>
    %47 = arith.index_cast %c5_i32 : i32 to index
    %c0_16 = arith.constant 0 : index
    %48 = vector.load %arg9[%47, %c0_16] : memref<16x128xf32, #tpu.memory_space<vmem>>, vector<1x128xf32>
    tpu.vector_store %arg9[%47, %c0_16], %46 {strides = array<i32>} : memref<16x128xf32, #tpu.memory_space<vmem>>, vector<1x128xf32>,
    %c6_i32 = arith.constant 6 : i32
    %49 = arith.addi %0, %c6_i32 : i32
    %50 = arith.index_cast %49 : i32 to index
    %51 = memref.load %arg1[%50] : memref<32xi32, #tpu.memory_space<smem>>
    %52 = arith.index_cast %51 : i32 to index
    %c0_17 = arith.constant 0 : index
    %53 = vector.load %arg3[%52, %c0_17] : memref<16x128xf32, #tpu.memory_space<vmem>>, vector<1x128xf32>
    %54 = arith.index_cast %c6_i32 : i32 to index
    %c0_18 = arith.constant 0 : index
    %55 = vector.load %arg9[%54, %c0_18] : memref<16x128xf32, #tpu.memory_space<vmem>>, vector<1x128xf32>
    tpu.vector_store %arg9[%54, %c0_18], %53 {strides = array<i32>} : memref<16x128xf32, #tpu.memory_space<vmem>>, vector<1x128xf32>,
    %c7_i32 = arith.constant 7 : i32
    %56 = arith.addi %0, %c7_i32 : i32
    %57 = arith.index_cast %56 : i32 to index
    %58 = memref.load %arg1[%57] : memref<32xi32, #tpu.memory_space<smem>>
    %59 = arith.index_cast %58 : i32 to index
    %c0_19 = arith.constant 0 : index
    %60 = vector.load %arg3[%59, %c0_19] : memref<16x128xf32, #tpu.memory_space<vmem>>, vector<1x128xf32>
    %61 = arith.index_cast %c7_i32 : i32 to index
    %c0_20 = arith.constant 0 : index
    %62 = vector.load %arg9[%61, %c0_20] : memref<16x128xf32, #tpu.memory_space<vmem>>, vector<1x128xf32>
    tpu.vector_store %arg9[%61, %c0_20], %60 {strides = array<i32>} : memref<16x128xf32, #tpu.memory_space<vmem>>, vector<1x128xf32>,
    %c8_i32 = arith.constant 8 : i32
    %63 = arith.addi %0, %c8_i32 : i32
    %64 = arith.index_cast %63 : i32 to index
    %65 = memref.load %arg1[%64] : memref<32xi32, #tpu.memory_space<smem>>
    %66 = arith.index_cast %65 : i32 to index
    %c0_21 = arith.constant 0 : index
    %67 = vector.load %arg3[%66, %c0_21] : memref<16x128xf32, #tpu.memory_space<vmem>>, vector<1x128xf32>
    %68 = arith.index_cast %c8_i32 : i32 to index
    %c0_22 = arith.constant 0 : index
    %69 = vector.load %arg9[%68, %c0_22] : memref<16x128xf32, #tpu.memory_space<vmem>>, vector<1x128xf32>
    tpu.vector_store %arg9[%68, %c0_22], %67 {strides = array<i32>} : memref<16x128xf32, #tpu.memory_space<vmem>>, vector<1x128xf32>,
    %c9_i32 = arith.constant 9 : i32
    %70 = arith.addi %0, %c9_i32 : i32
    %71 = arith.index_cast %70 : i32 to index
    %72 = memref.load %arg1[%71] : memref<32xi32, #tpu.memory_space<smem>>
    %73 = arith.index_cast %72 : i32 to index
    %c0_23 = arith.constant 0 : index
    %74 = vector.load %arg3[%73, %c0_23] : memref<16x128xf32, #tpu.memory_space<vmem>>, vector<1x128xf32>
    %75 = arith.index_cast %c9_i32 : i32 to index
    %c0_24 = arith.constant 0 : index
    %76 = vector.load %arg9[%75, %c0_24] : memref<16x128xf32, #tpu.memory_space<vmem>>, vector<1x128xf32>
    tpu.vector_store %arg9[%75, %c0_24], %74 {strides = array<i32>} : memref<16x128xf32, #tpu.memory_space<vmem>>, vector<1x128xf32>,
    %c10_i32 = arith.constant 10 : i32
    %77 = arith.addi %0, %c10_i32 : i32
    %78 = arith.index_cast %77 : i32 to index
    %79 = memref.load %arg1[%78] : memref<32xi32, #tpu.memory_space<smem>>
    %80 = arith.index_cast %79 : i32 to index
    %c0_25 = arith.constant 0 : index
    %81 = vector.load %arg3[%80, %c0_25] : memref<16x128xf32, #tpu.memory_space<vmem>>, vector<1x128xf32>
    %82 = arith.index_cast %c10_i32 : i32 to index
    %c0_26 = arith.constant 0 : index
    %83 = vector.load %arg9[%82, %c0_26] : memref<16x128xf32, #tpu.memory_space<vmem>>, vector<1x128xf32>
    tpu.vector_store %arg9[%82, %c0_26], %81 {strides = array<i32>} : memref<16x128xf32, #tpu.memory_space<vmem>>, vector<1x128xf32>,
    %c11_i32 = arith.constant 11 : i32
    %84 = arith.addi %0, %c11_i32 : i32
    %85 = arith.index_cast %84 : i32 to index
    %86 = memref.load %arg1[%85] : memref<32xi32, #tpu.memory_space<smem>>
    %87 = arith.index_cast %86 : i32 to index
    %c0_27 = arith.constant 0 : index
    %88 = vector.load %arg3[%87, %c0_27] : memref<16x128xf32, #tpu.memory_space<vmem>>, vector<1x128xf32>
    %89 = arith.index_cast %c11_i32 : i32 to index
    %c0_28 = arith.constant 0 : index
    %90 = vector.load %arg9[%89, %c0_28] : memref<16x128xf32, #tpu.memory_space<vmem>>, vector<1x128xf32>
    tpu.vector_store %arg9[%89, %c0_28], %88 {strides = array<i32>} : memref<16x128xf32, #tpu.memory_space<vmem>>, vector<1x128xf32>,
    %c12_i32 = arith.constant 12 : i32
    %91 = arith.addi %0, %c12_i32 : i32
    %92 = arith.index_cast %91 : i32 to index
    %93 = memref.load %arg1[%92] : memref<32xi32, #tpu.memory_space<smem>>
    %94 = arith.index_cast %93 : i32 to index
    %c0_29 = arith.constant 0 : index
    %95 = vector.load %arg3[%94, %c0_29] : memref<16x128xf32, #tpu.memory_space<vmem>>, vector<1x128xf32>
    %96 = arith.index_cast %c12_i32 : i32 to index
    %c0_30 = arith.constant 0 : index
    %97 = vector.load %arg9[%96, %c0_30] : memref<16x128xf32, #tpu.memory_space<vmem>>, vector<1x128xf32>
    tpu.vector_store %arg9[%96, %c0_30], %95 {strides = array<i32>} : memref<16x128xf32, #tpu.memory_space<vmem>>, vector<1x128xf32>,
    %c13_i32 = arith.constant 13 : i32
    %98 = arith.addi %0, %c13_i32 : i32
    %99 = arith.index_cast %98 : i32 to index
    %100 = memref.load %arg1[%99] : memref<32xi32, #tpu.memory_space<smem>>
    %101 = arith.index_cast %100 : i32 to index
    %c0_31 = arith.constant 0 : index
    %102 = vector.load %arg3[%101, %c0_31] : memref<16x128xf32, #tpu.memory_space<vmem>>, vector<1x128xf32>
    %103 = arith.index_cast %c13_i32 : i32 to index
    %c0_32 = arith.constant 0 : index
    %104 = vector.load %arg9[%103, %c0_32] : memref<16x128xf32, #tpu.memory_space<vmem>>, vector<1x128xf32>
    tpu.vector_store %arg9[%103, %c0_32], %102 {strides = array<i32>} : memref<16x128xf32, #tpu.memory_space<vmem>>, vector<1x128xf32>,
    %c14_i32 = arith.constant 14 : i32
    %105 = arith.addi %0, %c14_i32 : i32
    %106 = arith.index_cast %105 : i32 to index
    %107 = memref.load %arg1[%106] : memref<32xi32, #tpu.memory_space<smem>>
    %108 = arith.index_cast %107 : i32 to index
    %c0_33 = arith.constant 0 : index
    %109 = vector.load %arg3[%108, %c0_33] : memref<16x128xf32, #tpu.memory_space<vmem>>, vector<1x128xf32>
    %110 = arith.index_cast %c14_i32 : i32 to index
    %c0_34 = arith.constant 0 : index
    %111 = vector.load %arg9[%110, %c0_34] : memref<16x128xf32, #tpu.memory_space<vmem>>, vector<1x128xf32>
    tpu.vector_store %arg9[%110, %c0_34], %109 {strides = array<i32>} : memref<16x128xf32, #tpu.memory_space<vmem>>, vector<1x128xf32>,
    %c15_i32 = arith.constant 15 : i32
    %112 = arith.addi %0, %c15_i32 : i32
    %113 = arith.index_cast %112 : i32 to index
    %114 = memref.load %arg1[%113] : memref<32xi32, #tpu.memory_space<smem>>
    %115 = arith.index_cast %114 : i32 to index
    %c0_35 = arith.constant 0 : index
    %116 = vector.load %arg3[%115, %c0_35] : memref<16x128xf32, #tpu.memory_space<vmem>>, vector<1x128xf32>
    %117 = arith.index_cast %c15_i32 : i32 to index
    %c0_36 = arith.constant 0 : index
    %118 = vector.load %arg9[%117, %c0_36] : memref<16x128xf32, #tpu.memory_space<vmem>>, vector<1x128xf32>
    tpu.vector_store %arg9[%117, %c0_36], %116 {strides = array<i32>} : memref<16x128xf32, #tpu.memory_space<vmem>>, vector<1x128xf32>,
    %c16_i32_37 = arith.constant 16 : i32
    %c0_38 = arith.constant 0 : index
    %c0_39 = arith.constant 0 : index
    %119 = vector.load %arg9[%c0_38, %c0_39] : memref<16x128xf32, #tpu.memory_space<vmem>>, vector<16x128xf32>
    %120 = arith.mulf %119, %6 : vector<16x128xf32>
    %c0_40 = arith.constant 0 : index
    %c0_41 = arith.constant 0 : index
    %121 = vector.load %arg7[%c0_40, %c0_41] : memref<16x128xf32, #tpu.memory_space<vmem>>, vector<16x128xf32>
    tpu.vector_store %arg7[%c0_40, %c0_41], %120 {strides = array<i32>} : memref<16x128xf32, #tpu.memory_space<vmem>>, vector<16x128xf32>,
    %c0_i32_42 = arith.constant 0 : i32
    %122 = arith.addi %0, %c0_i32_42 : i32
    %123 = arith.index_cast %122 : i32 to index
    %124 = memref.load %arg2[%123] : memref<32xi32, #tpu.memory_space<smem>>
    %125 = arith.index_cast %124 : i32 to index
    %c0_43 = arith.constant 0 : index
    %126 = vector.load %arg8[%125, %c0_43] : memref<16x128xf32, #tpu.memory_space<vmem>>, vector<1x128xf32>
    %127 = arith.index_cast %c0_i32_42 : i32 to index
    %c0_44 = arith.constant 0 : index
    %128 = vector.load %arg7[%127, %c0_44] : memref<16x128xf32, #tpu.memory_space<vmem>>, vector<1x128xf32>
    %129 = arith.addf %126, %128 : vector<1x128xf32>
    %130 = arith.index_cast %124 : i32 to index
    %c0_45 = arith.constant 0 : index
    %131 = vector.load %arg8[%130, %c0_45] : memref<16x128xf32, #tpu.memory_space<vmem>>, vector<1x128xf32>
    tpu.vector_store %arg8[%130, %c0_45], %129 {strides = array<i32>} : memref<16x128xf32, #tpu.memory_space<vmem>>, vector<1x128xf32>,
    %c1_i32_46 = arith.constant 1 : i32
    %132 = arith.addi %0, %c1_i32_46 : i32
    %133 = arith.index_cast %132 : i32 to index
    %134 = memref.load %arg2[%133] : memref<32xi32, #tpu.memory_space<smem>>
    %135 = arith.index_cast %134 : i32 to index
    %c0_47 = arith.constant 0 : index
    %136 = vector.load %arg8[%135, %c0_47] : memref<16x128xf32, #tpu.memory_space<vmem>>, vector<1x128xf32>
    %137 = arith.index_cast %c1_i32_46 : i32 to index
    %c0_48 = arith.constant 0 : index
    %138 = vector.load %arg7[%137, %c0_48] : memref<16x128xf32, #tpu.memory_space<vmem>>, vector<1x128xf32>
    %139 = arith.addf %136, %138 : vector<1x128xf32>
    %140 = arith.index_cast %134 : i32 to index
    %c0_49 = arith.constant 0 : index
    %141 = vector.load %arg8[%140, %c0_49] : memref<16x128xf32, #tpu.memory_space<vmem>>, vector<1x128xf32>
    tpu.vector_store %arg8[%140, %c0_49], %139 {strides = array<i32>} : memref<16x128xf32, #tpu.memory_space<vmem>>, vector<1x128xf32>,
    %c2_i32_50 = arith.constant 2 : i32
    %142 = arith.addi %0, %c2_i32_50 : i32
    %143 = arith.index_cast %142 : i32 to index
    %144 = memref.load %arg2[%143] : memref<32xi32, #tpu.memory_space<smem>>
    %145 = arith.index_cast %144 : i32 to index
    %c0_51 = arith.constant 0 : index
    %146 = vector.load %arg8[%145, %c0_51] : memref<16x128xf32, #tpu.memory_space<vmem>>, vector<1x128xf32>
    %147 = arith.index_cast %c2_i32_50 : i32 to index
    %c0_52 = arith.constant 0 : index
    %148 = vector.load %arg7[%147, %c0_52] : memref<16x128xf32, #tpu.memory_space<vmem>>, vector<1x128xf32>
    %149 = arith.addf %146, %148 : vector<1x128xf32>
    %150 = arith.index_cast %144 : i32 to index
    %c0_53 = arith.constant 0 : index
    %151 = vector.load %arg8[%150, %c0_53] : memref<16x128xf32, #tpu.memory_space<vmem>>, vector<1x128xf32>
    tpu.vector_store %arg8[%150, %c0_53], %149 {strides = array<i32>} : memref<16x128xf32, #tpu.memory_space<vmem>>, vector<1x128xf32>,
    %c3_i32_54 = arith.constant 3 : i32
    %152 = arith.addi %0, %c3_i32_54 : i32
    %153 = arith.index_cast %152 : i32 to index
    %154 = memref.load %arg2[%153] : memref<32xi32, #tpu.memory_space<smem>>
    %155 = arith.index_cast %154 : i32 to index
    %c0_55 = arith.constant 0 : index
    %156 = vector.load %arg8[%155, %c0_55] : memref<16x128xf32, #tpu.memory_space<vmem>>, vector<1x128xf32>
    %157 = arith.index_cast %c3_i32_54 : i32 to index
    %c0_56 = arith.constant 0 : index
    %158 = vector.load %arg7[%157, %c0_56] : memref<16x128xf32, #tpu.memory_space<vmem>>, vector<1x128xf32>
    %159 = arith.addf %156, %158 : vector<1x128xf32>
    %160 = arith.index_cast %154 : i32 to index
    %c0_57 = arith.constant 0 : index
    %161 = vector.load %arg8[%160, %c0_57] : memref<16x128xf32, #tpu.memory_space<vmem>>, vector<1x128xf32>
    tpu.vector_store %arg8[%160, %c0_57], %159 {strides = array<i32>} : memref<16x128xf32, #tpu.memory_space<vmem>>, vector<1x128xf32>,
    %c4_i32_58 = arith.constant 4 : i32
    %162 = arith.addi %0, %c4_i32_58 : i32
    %163 = arith.index_cast %162 : i32 to index
    %164 = memref.load %arg2[%163] : memref<32xi32, #tpu.memory_space<smem>>
    %165 = arith.index_cast %164 : i32 to index
    %c0_59 = arith.constant 0 : index
    %166 = vector.load %arg8[%165, %c0_59] : memref<16x128xf32, #tpu.memory_space<vmem>>, vector<1x128xf32>
    %167 = arith.index_cast %c4_i32_58 : i32 to index
    %c0_60 = arith.constant 0 : index
    %168 = vector.load %arg7[%167, %c0_60] : memref<16x128xf32, #tpu.memory_space<vmem>>, vector<1x128xf32>
    %169 = arith.addf %166, %168 : vector<1x128xf32>
    %170 = arith.index_cast %164 : i32 to index
    %c0_61 = arith.constant 0 : index
    %171 = vector.load %arg8[%170, %c0_61] : memref<16x128xf32, #tpu.memory_space<vmem>>, vector<1x128xf32>
    tpu.vector_store %arg8[%170, %c0_61], %169 {strides = array<i32>} : memref<16x128xf32, #tpu.memory_space<vmem>>, vector<1x128xf32>,
    %c5_i32_62 = arith.constant 5 : i32
    %172 = arith.addi %0, %c5_i32_62 : i32
    %173 = arith.index_cast %172 : i32 to index
    %174 = memref.load %arg2[%173] : memref<32xi32, #tpu.memory_space<smem>>
    %175 = arith.index_cast %174 : i32 to index
    %c0_63 = arith.constant 0 : index
    %176 = vector.load %arg8[%175, %c0_63] : memref<16x128xf32, #tpu.memory_space<vmem>>, vector<1x128xf32>
    %177 = arith.index_cast %c5_i32_62 : i32 to index
    %c0_64 = arith.constant 0 : index
    %178 = vector.load %arg7[%177, %c0_64] : memref<16x128xf32, #tpu.memory_space<vmem>>, vector<1x128xf32>
    %179 = arith.addf %176, %178 : vector<1x128xf32>
    %180 = arith.index_cast %174 : i32 to index
    %c0_65 = arith.constant 0 : index
    %181 = vector.load %arg8[%180, %c0_65] : memref<16x128xf32, #tpu.memory_space<vmem>>, vector<1x128xf32>
    tpu.vector_store %arg8[%180, %c0_65], %179 {strides = array<i32>} : memref<16x128xf32, #tpu.memory_space<vmem>>, vector<1x128xf32>,
    %c6_i32_66 = arith.constant 6 : i32
    %182 = arith.addi %0, %c6_i32_66 : i32
    %183 = arith.index_cast %182 : i32 to index
    %184 = memref.load %arg2[%183] : memref<32xi32, #tpu.memory_space<smem>>
    %185 = arith.index_cast %184 : i32 to index
    %c0_67 = arith.constant 0 : index
    %186 = vector.load %arg8[%185, %c0_67] : memref<16x128xf32, #tpu.memory_space<vmem>>, vector<1x128xf32>
    %187 = arith.index_cast %c6_i32_66 : i32 to index
    %c0_68 = arith.constant 0 : index
    %188 = vector.load %arg7[%187, %c0_68] : memref<16x128xf32, #tpu.memory_space<vmem>>, vector<1x128xf32>
    %189 = arith.addf %186, %188 : vector<1x128xf32>
    %190 = arith.index_cast %184 : i32 to index
    %c0_69 = arith.constant 0 : index
    %191 = vector.load %arg8[%190, %c0_69] : memref<16x128xf32, #tpu.memory_space<vmem>>, vector<1x128xf32>
    tpu.vector_store %arg8[%190, %c0_69], %189 {strides = array<i32>} : memref<16x128xf32, #tpu.memory_space<vmem>>, vector<1x128xf32>,
    %c7_i32_70 = arith.constant 7 : i32
    %192 = arith.addi %0, %c7_i32_70 : i32
    %193 = arith.index_cast %192 : i32 to index
    %194 = memref.load %arg2[%193] : memref<32xi32, #tpu.memory_space<smem>>
    %195 = arith.index_cast %194 : i32 to index
    %c0_71 = arith.constant 0 : index
    %196 = vector.load %arg8[%195, %c0_71] : memref<16x128xf32, #tpu.memory_space<vmem>>, vector<1x128xf32>
    %197 = arith.index_cast %c7_i32_70 : i32 to index
    %c0_72 = arith.constant 0 : index
    %198 = vector.load %arg7[%197, %c0_72] : memref<16x128xf32, #tpu.memory_space<vmem>>, vector<1x128xf32>
    %199 = arith.addf %196, %198 : vector<1x128xf32>
    %200 = arith.index_cast %194 : i32 to index
    %c0_73 = arith.constant 0 : index
    %201 = vector.load %arg8[%200, %c0_73] : memref<16x128xf32, #tpu.memory_space<vmem>>, vector<1x128xf32>
    tpu.vector_store %arg8[%200, %c0_73], %199 {strides = array<i32>} : memref<16x128xf32, #tpu.memory_space<vmem>>, vector<1x128xf32>,
    %c8_i32_74 = arith.constant 8 : i32
    %202 = arith.addi %0, %c8_i32_74 : i32
    %203 = arith.index_cast %202 : i32 to index
    %204 = memref.load %arg2[%203] : memref<32xi32, #tpu.memory_space<smem>>
    %205 = arith.index_cast %204 : i32 to index
    %c0_75 = arith.constant 0 : index
    %206 = vector.load %arg8[%205, %c0_75] : memref<16x128xf32, #tpu.memory_space<vmem>>, vector<1x128xf32>
    %207 = arith.index_cast %c8_i32_74 : i32 to index
    %c0_76 = arith.constant 0 : index
    %208 = vector.load %arg7[%207, %c0_76] : memref<16x128xf32, #tpu.memory_space<vmem>>, vector<1x128xf32>
    %209 = arith.addf %206, %208 : vector<1x128xf32>
    %210 = arith.index_cast %204 : i32 to index
    %c0_77 = arith.constant 0 : index
    %211 = vector.load %arg8[%210, %c0_77] : memref<16x128xf32, #tpu.memory_space<vmem>>, vector<1x128xf32>
    tpu.vector_store %arg8[%210, %c0_77], %209 {strides = array<i32>} : memref<16x128xf32, #tpu.memory_space<vmem>>, vector<1x128xf32>,
    %c9_i32_78 = arith.constant 9 : i32
    %212 = arith.addi %0, %c9_i32_78 : i32
    %213 = arith.index_cast %212 : i32 to index
    %214 = memref.load %arg2[%213] : memref<32xi32, #tpu.memory_space<smem>>
    %215 = arith.index_cast %214 : i32 to index
    %c0_79 = arith.constant 0 : index
    %216 = vector.load %arg8[%215, %c0_79] : memref<16x128xf32, #tpu.memory_space<vmem>>, vector<1x128xf32>
    %217 = arith.index_cast %c9_i32_78 : i32 to index
    %c0_80 = arith.constant 0 : index
    %218 = vector.load %arg7[%217, %c0_80] : memref<16x128xf32, #tpu.memory_space<vmem>>, vector<1x128xf32>
    %219 = arith.addf %216, %218 : vector<1x128xf32>
    %220 = arith.index_cast %214 : i32 to index
    %c0_81 = arith.constant 0 : index
    %221 = vector.load %arg8[%220, %c0_81] : memref<16x128xf32, #tpu.memory_space<vmem>>, vector<1x128xf32>
    tpu.vector_store %arg8[%220, %c0_81], %219 {strides = array<i32>} : memref<16x128xf32, #tpu.memory_space<vmem>>, vector<1x128xf32>,
    %c10_i32_82 = arith.constant 10 : i32
    %222 = arith.addi %0, %c10_i32_82 : i32
    %223 = arith.index_cast %222 : i32 to index
    %224 = memref.load %arg2[%223] : memref<32xi32, #tpu.memory_space<smem>>
    %225 = arith.index_cast %224 : i32 to index
    %c0_83 = arith.constant 0 : index
    %226 = vector.load %arg8[%225, %c0_83] : memref<16x128xf32, #tpu.memory_space<vmem>>, vector<1x128xf32>
    %227 = arith.index_cast %c10_i32_82 : i32 to index
    %c0_84 = arith.constant 0 : index
    %228 = vector.load %arg7[%227, %c0_84] : memref<16x128xf32, #tpu.memory_space<vmem>>, vector<1x128xf32>
    %229 = arith.addf %226, %228 : vector<1x128xf32>
    %230 = arith.index_cast %224 : i32 to index
    %c0_85 = arith.constant 0 : index
    %231 = vector.load %arg8[%230, %c0_85] : memref<16x128xf32, #tpu.memory_space<vmem>>, vector<1x128xf32>
    tpu.vector_store %arg8[%230, %c0_85], %229 {strides = array<i32>} : memref<16x128xf32, #tpu.memory_space<vmem>>, vector<1x128xf32>,
    %c11_i32_86 = arith.constant 11 : i32
    %232 = arith.addi %0, %c11_i32_86 : i32
    %233 = arith.index_cast %232 : i32 to index
    %234 = memref.load %arg2[%233] : memref<32xi32, #tpu.memory_space<smem>>
    %235 = arith.index_cast %234 : i32 to index
    %c0_87 = arith.constant 0 : index
    %236 = vector.load %arg8[%235, %c0_87] : memref<16x128xf32, #tpu.memory_space<vmem>>, vector<1x128xf32>
    %237 = arith.index_cast %c11_i32_86 : i32 to index
    %c0_88 = arith.constant 0 : index
    %238 = vector.load %arg7[%237, %c0_88] : memref<16x128xf32, #tpu.memory_space<vmem>>, vector<1x128xf32>
    %239 = arith.addf %236, %238 : vector<1x128xf32>
    %240 = arith.index_cast %234 : i32 to index
    %c0_89 = arith.constant 0 : index
    %241 = vector.load %arg8[%240, %c0_89] : memref<16x128xf32, #tpu.memory_space<vmem>>, vector<1x128xf32>
    tpu.vector_store %arg8[%240, %c0_89], %239 {strides = array<i32>} : memref<16x128xf32, #tpu.memory_space<vmem>>, vector<1x128xf32>,
    %c12_i32_90 = arith.constant 12 : i32
    %242 = arith.addi %0, %c12_i32_90 : i32
    %243 = arith.index_cast %242 : i32 to index
    %244 = memref.load %arg2[%243] : memref<32xi32, #tpu.memory_space<smem>>
    %245 = arith.index_cast %244 : i32 to index
    %c0_91 = arith.constant 0 : index
    %246 = vector.load %arg8[%245, %c0_91] : memref<16x128xf32, #tpu.memory_space<vmem>>, vector<1x128xf32>
    %247 = arith.index_cast %c12_i32_90 : i32 to index
    %c0_92 = arith.constant 0 : index
    %248 = vector.load %arg7[%247, %c0_92] : memref<16x128xf32, #tpu.memory_space<vmem>>, vector<1x128xf32>
    %249 = arith.addf %246, %248 : vector<1x128xf32>
    %250 = arith.index_cast %244 : i32 to index
    %c0_93 = arith.constant 0 : index
    %251 = vector.load %arg8[%250, %c0_93] : memref<16x128xf32, #tpu.memory_space<vmem>>, vector<1x128xf32>
    tpu.vector_store %arg8[%250, %c0_93], %249 {strides = array<i32>} : memref<16x128xf32, #tpu.memory_space<vmem>>, vector<1x128xf32>,
    %c13_i32_94 = arith.constant 13 : i32
    %252 = arith.addi %0, %c13_i32_94 : i32
    %253 = arith.index_cast %252 : i32 to index
    %254 = memref.load %arg2[%253] : memref<32xi32, #tpu.memory_space<smem>>
    %255 = arith.index_cast %254 : i32 to index
    %c0_95 = arith.constant 0 : index
    %256 = vector.load %arg8[%255, %c0_95] : memref<16x128xf32, #tpu.memory_space<vmem>>, vector<1x128xf32>
    %257 = arith.index_cast %c13_i32_94 : i32 to index
    %c0_96 = arith.constant 0 : index
    %258 = vector.load %arg7[%257, %c0_96] : memref<16x128xf32, #tpu.memory_space<vmem>>, vector<1x128xf32>
    %259 = arith.addf %256, %258 : vector<1x128xf32>
    %260 = arith.index_cast %254 : i32 to index
    %c0_97 = arith.constant 0 : index
    %261 = vector.load %arg8[%260, %c0_97] : memref<16x128xf32, #tpu.memory_space<vmem>>, vector<1x128xf32>
    tpu.vector_store %arg8[%260, %c0_97], %259 {strides = array<i32>} : memref<16x128xf32, #tpu.memory_space<vmem>>, vector<1x128xf32>,
    %c14_i32_98 = arith.constant 14 : i32
    %262 = arith.addi %0, %c14_i32_98 : i32
    %263 = arith.index_cast %262 : i32 to index
    %264 = memref.load %arg2[%263] : memref<32xi32, #tpu.memory_space<smem>>
    %265 = arith.index_cast %264 : i32 to index
    %c0_99 = arith.constant 0 : index
    %266 = vector.load %arg8[%265, %c0_99] : memref<16x128xf32, #tpu.memory_space<vmem>>, vector<1x128xf32>
    %267 = arith.index_cast %c14_i32_98 : i32 to index
    %c0_100 = arith.constant 0 : index
    %268 = vector.load %arg7[%267, %c0_100] : memref<16x128xf32, #tpu.memory_space<vmem>>, vector<1x128xf32>
    %269 = arith.addf %266, %268 : vector<1x128xf32>
    %270 = arith.index_cast %264 : i32 to index
    %c0_101 = arith.constant 0 : index
    %271 = vector.load %arg8[%270, %c0_101] : memref<16x128xf32, #tpu.memory_space<vmem>>, vector<1x128xf32>
    tpu.vector_store %arg8[%270, %c0_101], %269 {strides = array<i32>} : memref<16x128xf32, #tpu.memory_space<vmem>>, vector<1x128xf32>,
    %c15_i32_102 = arith.constant 15 : i32
    %272 = arith.addi %0, %c15_i32_102 : i32
    %273 = arith.index_cast %272 : i32 to index
    %274 = memref.load %arg2[%273] : memref<32xi32, #tpu.memory_space<smem>>
    %275 = arith.index_cast %274 : i32 to index
    %c0_103 = arith.constant 0 : index
    %276 = vector.load %arg8[%275, %c0_103] : memref<16x128xf32, #tpu.memory_space<vmem>>, vector<1x128xf32>
    %277 = arith.index_cast %c15_i32_102 : i32 to index
    %c0_104 = arith.constant 0 : index
    %278 = vector.load %arg7[%277, %c0_104] : memref<16x128xf32, #tpu.memory_space<vmem>>, vector<1x128xf32>
    %279 = arith.addf %276, %278 : vector<1x128xf32>
    %280 = arith.index_cast %274 : i32 to index
    %c0_105 = arith.constant 0 : index
    %281 = vector.load %arg8[%280, %c0_105] : memref<16x128xf32, #tpu.memory_space<vmem>>, vector<1x128xf32>
    tpu.vector_store %arg8[%280, %c0_105], %279 {strides = array<i32>} : memref<16x128xf32, #tpu.memory_space<vmem>>, vector<1x128xf32>,
    %c16_i32_106 = arith.constant 16 : i32
    return
  }
  func.func @transform_0(%arg0: i32, %arg1: memref<32xi32, #tpu.memory_space<smem>>, %arg2: memref<32xi32, #tpu.memory_space<smem>>) -> (i32, i32) {
    %c0_i32 = arith.constant 0 : i32
    %c0_i32_0 = arith.constant 0 : i32
    %c0_i32_1 = arith.constant 0 : i32
    return %c0_i32, %c0_i32_0 : i32, i32
  }
  func.func @transform_1(%arg0: i32, %arg1: memref<32xi32, #tpu.memory_space<smem>>, %arg2: memref<32xi32, #tpu.memory_space<smem>>) -> (i32, i32) {
    %c0_i32 = arith.constant 0 : i32
    %c0_i32_0 = arith.constant 0 : i32
    return %arg0, %c0_i32 : i32, i32
  }
  func.func @transform_2(%arg0: i32, %arg1: memref<32xi32, #tpu.memory_space<smem>>, %arg2: memref<32xi32, #tpu.memory_space<smem>>) -> (i32, i32) {
    %c0_i32 = arith.constant 0 : i32
    %c0_i32_0 = arith.constant 0 : i32
    %c0_i32_1 = arith.constant 0 : i32
    return %c0_i32, %c0_i32_0 : i32, i32
  }
  func.func @transform_3(%arg0: i32, %arg1: memref<32xi32, #tpu.memory_space<smem>>, %arg2: memref<32xi32, #tpu.memory_space<smem>>) -> (i32, i32) {
    %c0_i32 = arith.constant 0 : i32
    %c0_i32_0 = arith.constant 0 : i32
    %c0_i32_1 = arith.constant 0 : i32
    return %c0_i32, %c0_i32_0 : i32, i32
  }
  func.func @transform_4(%arg0: i32, %arg1: memref<32xi32, #tpu.memory_space<smem>>, %arg2: memref<32xi32, #tpu.memory_space<smem>>) -> (i32, i32) {
    %c0_i32 = arith.constant 0 : i32
    %c0_i32_0 = arith.constant 0 : i32
    return %arg0, %c0_i32 : i32, i32
  }
  func.func @transform_5(%arg0: i32, %arg1: memref<32xi32, #tpu.memory_space<smem>>, %arg2: memref<32xi32, #tpu.memory_space<smem>>) -> (i32, i32) {
    %c0_i32 = arith.constant 0 : i32
    %c0_i32_0 = arith.constant 0 : i32
    %c0_i32_1 = arith.constant 0 : i32
    return %c0_i32, %c0_i32_0 : i32, i32
  }
}

module attributes {stable_mosaic.version = 11 : i64} {
  func.func @_mlp_kernel(%arg0: i32, %arg1: memref<8x128xf32, #tpu.memory_space<vmem>>, %arg2: memref<8x128xf32, #tpu.memory_space<vmem>>, %arg3: memref<1x128xf32, #tpu.memory_space<vmem>>, %arg4: memref<1x128xf32, #tpu.memory_space<vmem>>, %arg5: memref<128x128xf32, #tpu.memory_space<vmem>>, %arg6: memref<1x128xf32, #tpu.memory_space<vmem>>, %arg7: memref<128x128xf32, #tpu.memory_space<vmem>>, %arg8: memref<1x128xf32, #tpu.memory_space<vmem>>, %arg9: memref<1x128xf32, #tpu.memory_space<vmem>>, %arg10: memref<8x128xf32, #tpu.memory_space<vmem>>) attributes {dimension_semantics = [#tpu.dimension_semantics<parallel>], iteration_bounds = array<i64: 2>, scalar_prefetch = 0 : i64, scratch_operands = 0 : i64, tpu.core_type = #tpu.core_type<tc>, window_params = [{transform_indices = @transform_0, window_bounds = array<i64: 8, 128>}, {transform_indices = @transform_1, window_bounds = array<i64: 8, 128>}, {pipeline_mode = #tpu.pipeline_mode<synchronous>, transform_indices = @transform_2, window_bounds = array<i64: 1, 128>}, {pipeline_mode = #tpu.pipeline_mode<synchronous>, transform_indices = @transform_3, window_bounds = array<i64: 1, 128>}, {pipeline_mode = #tpu.pipeline_mode<synchronous>, transform_indices = @transform_4, window_bounds = array<i64: 128, 128>}, {pipeline_mode = #tpu.pipeline_mode<synchronous>, transform_indices = @transform_5, window_bounds = array<i64: 1, 128>}, {pipeline_mode = #tpu.pipeline_mode<synchronous>, transform_indices = @transform_6, window_bounds = array<i64: 128, 128>}, {pipeline_mode = #tpu.pipeline_mode<synchronous>, transform_indices = @transform_7, window_bounds = array<i64: 1, 128>}, {pipeline_mode = #tpu.pipeline_mode<synchronous>, transform_indices = @transform_8, window_bounds = array<i64: 1, 128>}, {transform_indices = @transform_9, window_bounds = array<i64: 8, 128>}]} {
    %c0 = arith.constant 0 : index
    %c0_0 = arith.constant 0 : index
    %0 = vector.load %arg1[%c0, %c0_0] : memref<8x128xf32, #tpu.memory_space<vmem>>, vector<8x128xf32>
    %1 = tpu.iota {dimensions = array<i32: 1>} : vector<1x128xi32>
    %c8_i32 = arith.constant 8 : i32
    %2 = vector.broadcast %c8_i32 : i32 to vector<1x128xi32>
    %3 = arith.cmpi slt, %1, %2 : vector<1x128xi32>
    %4 = arith.extui %3 : vector<1x128xi1> to vector<1x128xi32>
    %5 = arith.sitofp %4 : vector<1x128xi32> to vector<1x128xf32>
    %6 = vector.broadcast %5 : vector<1x128xf32> to vector<8x128xf32>
    %7 = arith.mulf %0, %6 : vector<8x128xf32>
    %cst = arith.constant dense<0.000000e+00> : vector<8xf32>
    %8 = vector.multi_reduction <add>, %7, %cst [1] : vector<8x128xf32> to vector<8xf32>
    %9 = vector.shape_cast %8 : vector<8xf32> to vector<8x1xf32>
    %cst_1 = arith.constant 1.250000e-01 : f32
    %10 = vector.broadcast %cst_1 : f32 to vector<8x1xf32>
    %11 = arith.mulf %9, %10 : vector<8x1xf32>
    %12 = vector.broadcast %11 : vector<8x1xf32> to vector<8x128xf32>
    %13 = arith.subf %0, %12 : vector<8x128xf32>
    %14 = vector.broadcast %5 : vector<1x128xf32> to vector<8x128xf32>
    %15 = arith.mulf %13, %14 : vector<8x128xf32>
    %16 = arith.mulf %15, %15 : vector<8x128xf32>
    %cst_2 = arith.constant dense<0.000000e+00> : vector<8xf32>
    %17 = vector.multi_reduction <add>, %16, %cst_2 [1] : vector<8x128xf32> to vector<8xf32>
    %18 = vector.shape_cast %17 : vector<8xf32> to vector<8x1xf32>
    %cst_3 = arith.constant 1.250000e-01 : f32
    %19 = vector.broadcast %cst_3 : f32 to vector<8x1xf32>
    %20 = arith.mulf %18, %19 : vector<8x1xf32>
    %cst_4 = arith.constant 9.99999974E-6 : f32
    %21 = vector.broadcast %cst_4 : f32 to vector<8x1xf32>
    %22 = arith.addf %20, %21 : vector<8x1xf32>
    %23 = math.rsqrt %22 : vector<8x1xf32>
    %24 = vector.broadcast %23 : vector<8x1xf32> to vector<8x128xf32>
    %25 = arith.mulf %15, %24 : vector<8x128xf32>
    %c0_5 = arith.constant 0 : index
    %c0_6 = arith.constant 0 : index
    %26 = vector.load %arg3[%c0_5, %c0_6] : memref<1x128xf32, #tpu.memory_space<vmem>>, vector<1x128xf32>
    %27 = vector.broadcast %26 : vector<1x128xf32> to vector<8x128xf32>
    %28 = arith.mulf %25, %27 : vector<8x128xf32>
    %c0_7 = arith.constant 0 : index
    %c0_8 = arith.constant 0 : index
    %29 = vector.load %arg4[%c0_7, %c0_8] : memref<1x128xf32, #tpu.memory_space<vmem>>, vector<1x128xf32>
    %30 = vector.broadcast %29 : vector<1x128xf32> to vector<8x128xf32>
    %31 = arith.addf %28, %30 : vector<8x128xf32>
    %c0_9 = arith.constant 0 : index
    %c0_10 = arith.constant 0 : index
    %32 = vector.load %arg5[%c0_9, %c0_10] : memref<128x128xf32, #tpu.memory_space<vmem>>, vector<128x128xf32>
    %cst_11 = arith.constant dense<0.000000e+00> : vector<8x128xf32>
    %33 = tpu.matmul %31, %32, %cst_11 {dimension_numbers = #tpu.dot_dimension_numbers<[1], [0], [0], [1], [0, 0, 1, 1], [], []>} : vector<8x128xf32>, vector<128x128xf32>, vector<8x128xf32> -> vector<8x128xf32>
    %c0_12 = arith.constant 0 : index
    %c0_13 = arith.constant 0 : index
    %34 = vector.load %arg6[%c0_12, %c0_13] : memref<1x128xf32, #tpu.memory_space<vmem>>, vector<1x128xf32>
    %35 = vector.broadcast %34 : vector<1x128xf32> to vector<8x128xf32>
    %36 = arith.addf %33, %35 : vector<8x128xf32>
    %cst_14 = arith.constant 5.000000e-01 : f32
    %37 = vector.broadcast %cst_14 : f32 to vector<8x128xf32>
    %38 = arith.mulf %37, %36 : vector<8x128xf32>
    %cst_15 = arith.constant 0.707106769 : f32
    %39 = vector.broadcast %cst_15 : f32 to vector<8x128xf32>
    %40 = arith.mulf %36, %39 : vector<8x128xf32>
    %41 = math.erf %40 : vector<8x128xf32>
    %cst_16 = arith.constant 1.000000e+00 : f32
    %42 = vector.broadcast %cst_16 : f32 to vector<8x128xf32>
    %43 = arith.addf %42, %41 : vector<8x128xf32>
    %44 = arith.mulf %38, %43 : vector<8x128xf32>
    %c0_17 = arith.constant 0 : index
    %c0_18 = arith.constant 0 : index
    %45 = vector.load %arg7[%c0_17, %c0_18] : memref<128x128xf32, #tpu.memory_space<vmem>>, vector<128x128xf32>
    %cst_19 = arith.constant dense<0.000000e+00> : vector<8x128xf32>
    %46 = tpu.matmul %44, %45, %cst_19 {dimension_numbers = #tpu.dot_dimension_numbers<[1], [0], [0], [1], [0, 0, 1, 1], [], []>} : vector<8x128xf32>, vector<128x128xf32>, vector<8x128xf32> -> vector<8x128xf32>
    %c0_20 = arith.constant 0 : index
    %c0_21 = arith.constant 0 : index
    %47 = vector.load %arg8[%c0_20, %c0_21] : memref<1x128xf32, #tpu.memory_space<vmem>>, vector<1x128xf32>
    %48 = vector.broadcast %47 : vector<1x128xf32> to vector<8x128xf32>
    %49 = arith.addf %46, %48 : vector<8x128xf32>
    %c0_22 = arith.constant 0 : index
    %c0_23 = arith.constant 0 : index
    %50 = vector.load %arg9[%c0_22, %c0_23] : memref<1x128xf32, #tpu.memory_space<vmem>>, vector<1x128xf32>
    %51 = vector.broadcast %50 : vector<1x128xf32> to vector<8x128xf32>
    %52 = arith.mulf %49, %51 : vector<8x128xf32>
    %c0_24 = arith.constant 0 : index
    %c0_25 = arith.constant 0 : index
    %53 = vector.load %arg2[%c0_24, %c0_25] : memref<8x128xf32, #tpu.memory_space<vmem>>, vector<8x128xf32>
    %54 = arith.addf %52, %53 : vector<8x128xf32>
    %c0_26 = arith.constant 0 : index
    %c0_27 = arith.constant 0 : index
    %55 = vector.load %arg10[%c0_26, %c0_27] : memref<8x128xf32, #tpu.memory_space<vmem>>, vector<8x128xf32>
    tpu.vector_store %arg10[%c0_26, %c0_27], %54 {strides = array<i32>} : memref<8x128xf32, #tpu.memory_space<vmem>>, vector<8x128xf32>,
    return
  }
  func.func @transform_0(%arg0: i32) -> (i32, i32) {
    %c0_i32 = arith.constant 0 : i32
    %c0_i32_0 = arith.constant 0 : i32
    return %arg0, %c0_i32 : i32, i32
  }
  func.func @transform_1(%arg0: i32) -> (i32, i32) {
    %c0_i32 = arith.constant 0 : i32
    %c0_i32_0 = arith.constant 0 : i32
    return %arg0, %c0_i32 : i32, i32
  }
  func.func @transform_2(%arg0: i32) -> (i32, i32) {
    %c0_i32 = arith.constant 0 : i32
    %c0_i32_0 = arith.constant 0 : i32
    %c0_i32_1 = arith.constant 0 : i32
    return %c0_i32, %c0_i32_0 : i32, i32
  }
  func.func @transform_3(%arg0: i32) -> (i32, i32) {
    %c0_i32 = arith.constant 0 : i32
    %c0_i32_0 = arith.constant 0 : i32
    %c0_i32_1 = arith.constant 0 : i32
    return %c0_i32, %c0_i32_0 : i32, i32
  }
  func.func @transform_4(%arg0: i32) -> (i32, i32) {
    %c0_i32 = arith.constant 0 : i32
    %c0_i32_0 = arith.constant 0 : i32
    %c0_i32_1 = arith.constant 0 : i32
    return %c0_i32, %c0_i32_0 : i32, i32
  }
  func.func @transform_5(%arg0: i32) -> (i32, i32) {
    %c0_i32 = arith.constant 0 : i32
    %c0_i32_0 = arith.constant 0 : i32
    %c0_i32_1 = arith.constant 0 : i32
    return %c0_i32, %c0_i32_0 : i32, i32
  }
  func.func @transform_6(%arg0: i32) -> (i32, i32) {
    %c0_i32 = arith.constant 0 : i32
    %c0_i32_0 = arith.constant 0 : i32
    %c0_i32_1 = arith.constant 0 : i32
    return %c0_i32, %c0_i32_0 : i32, i32
  }
  func.func @transform_7(%arg0: i32) -> (i32, i32) {
    %c0_i32 = arith.constant 0 : i32
    %c0_i32_0 = arith.constant 0 : i32
    %c0_i32_1 = arith.constant 0 : i32
    return %c0_i32, %c0_i32_0 : i32, i32
  }
  func.func @transform_8(%arg0: i32) -> (i32, i32) {
    %c0_i32 = arith.constant 0 : i32
    %c0_i32_0 = arith.constant 0 : i32
    %c0_i32_1 = arith.constant 0 : i32
    return %c0_i32, %c0_i32_0 : i32, i32
  }
  func.func @transform_9(%arg0: i32) -> (i32, i32) {
    %c0_i32 = arith.constant 0 : i32
    %c0_i32_0 = arith.constant 0 : i32
    return %arg0, %c0_i32 : i32, i32
  }
}

</mosaic_0001>

<bundles_post_ra>
// kernel: convnext_forward.3
= control target key start
LH: loop header
LB: loop body
LE: loop exit
PB: predicated region body
PF: predicated region fallthrough
CT: control target
= control target key end

     0   :  { %s669_s30 = smov 0   ;;  %s805_s0 = inlined_call_operand.vmem [shape: f32[16,128], index: 0, kind: input, shape index: {}]   ;;  %s806_s1 = inlined_call_operand.vmem [shape: f32[16,128], index: 1, kind: input, shape index: {}, may-alias: {1,9}]   ;;  %s807_s2 = inlined_call_operand.vmem [shape: f32[1,128], index: 2, kind: input, shape index: {}]   ;;  %s808_s3 = inlined_call_operand.vmem [shape: f32[1,128], index: 3, kind: input, shape index: {}]   ;;  %s809_s4 = inlined_call_operand.vmem [shape: f32[128,128], index: 4, kind: input, shape index: {}]   ;;  %s810_s5 = inlined_call_operand.vmem [shape: f32[1,128], index: 5, kind: input, shape index: {}]   ;;  %s811_s6 = inlined_call_operand.vmem [shape: f32[128,128], index: 6, kind: input, shape index: {}]   ;;  %s812_s7 = inlined_call_operand.vmem [shape: f32[1,128], index: 7, kind: input, shape index: {}]   ;;  %s813_s8 = inlined_call_operand.vmem [shape: f32[1,128], index: 8, kind: input, shape index: {}]   ;;  %s814_s9 = inlined_call_operand.vmem [shape: f32[16,128], index: 9, kind: output, shape index: {}, may-alias: {1,9}]  }
   0x1 LB: > { %s580_s10 = sadd.s32 4294967295, %s616_s30   ;;  %p584_p0 = scmp.ge.s32.totalorder %s616_s30, 1  ;;  %s616_s30 = sphi %s669_s30, %s19_s30  }
   0x2   : > { %p295_p1 = scmp.lt.s32.totalorder %s616_s30, 3 }
   0x4   : > { %p296_p2 = pnand %p584_p0, %p295_p1 }
   0x5   : > { %p333_p3 = scmp.lt.s32.totalorder (!%p296_p2), %s580_s10, 1 }
   0x6   : > { %299 = sbr.rel (%p296_p2) target bundleno = 599 (0x257), region = 56 }
   0xb   : > { %v346_v0 = vlaneseq  ;;  %s816_s10 = smov (!%p333_p3, %s580_s10), 1  ;;  %v618_v2 = vmov 0.0   ;;  %v398_v6 = vld [vmem:[%s809_s4 + $0x78] sm:$0xff]  ;;  %v397_v7 = vld [vmem:[%s809_s4 + $0x70] sm:$0xff]  ;;  %v396_v13 = vld [vmem:[%s809_s4 + $0x68] sm:$0xff] }
   0xc   : > { %s677_s11 = sshll.u32 %s816_s10, 3  ;;  %403 = vmatpush.msra.mxu0 %v398_v6  ;;  %v395_v14 = vld [vmem:[%s809_s4 + $0x60] sm:$0xff]  ;;  %v394_v15 = vld [vmem:[%s809_s4 + $0x58] sm:$0xff]  ;;  %v393_v16 = vld [vmem:[%s809_s4 + $0x50] sm:$0xff] }
   0xd   : > { %v347_v1 = vand.u32 127, %v346_v0  ;;  %s336_s14 = scalar_lea.vmem %s805_s0, %s677_s11  ;;  %v392_v17 = vld [vmem:[%s809_s4 + $0x48] sm:$0xff]  ;;  %v391_v18 = vld [vmem:[%s809_s4 + $0x40] sm:$0xff]  ;;  %v390_v19 = vld [vmem:[%s809_s4 + $0x38] sm:$0xff]  ;;  %s340_s13 = scalar_lea.vmem %s806_s1, %s677_s11 }
   0xe   : > { %v345_v4 = vld [vmem:[%s336_s14] sm:$0xff]  ;;  %404 = vmatpush.msra.mxu0 %v397_v7  ;;  %v389_v20 = vld [vmem:[%s809_s4 + $0x30] sm:$0xff]  ;;  %v388_v21 = vld [vmem:[%s809_s4 + $0x28] sm:$0xff]  ;;  %s344_s18 = scalar_lea.vmem %s814_s9, %s677_s11 }
   0xf   : > { %vm348_vm0 = vcmp.lt.s32.totalorder %v347_v1, 8  ;;  %v387_v22 = vld [vmem:[%s809_s4 + $0x20] sm:$0xff]  ;;  %v386_v23 = vld [vmem:[%s809_s4 + $0x18] sm:$0xff]  ;;  %v385_v24 = vld [vmem:[%s809_s4 + $0x10] sm:$0xff] }
  0x10   : > { %v588_v3 = vsel %vm348_vm0, 1.0, %v618_v2  ;;  %405 = vmatpush.msra.mxu0 %v396_v13  ;;  %v384_v25 = vld [vmem:[%s809_s4 + $0x8] sm:$0xff]  ;;  %v383_v26 = vld [vmem:[%s809_s4] sm:$0xff]  ;;  %v482_v42 = vld [vmem:[%s811_s6 + $0x78] sm:$0xff] }
  0x11   : > { %v351_v5 = vmul.f32 %v588_v3, %v345_v4  ;;  %v601_v36 = vld [vmem:[%s807_s2] ss:$0 sm:$0xff]  ;;  %487 = vmatpush.msra.mxu1 %v482_v42  ;;  %v481_v43 = vld [vmem:[%s811_s6 + $0x70] sm:$0xff]  ;;  %v480_v44 = vld [vmem:[%s811_s6 + $0x68] sm:$0xff] }
  0x12   : > { %406 = vmatpush.msra.mxu0 %v395_v14  ;;  %v602_v39 = vld [vmem:[%s808_s3] ss:$0 sm:$0xff]  ;;  %v478_v47 = vld [vmem:[%s811_s6 + $0x58] sm:$0xff]  ;;  %v477_v48 = vld [vmem:[%s811_s6 + $0x50] sm:$0xff] }
  0x13   : > { %352 = vadd.xlane.f32.xlu0 %v351_v5  ;;  %488 = vmatpush.msra.mxu1 %v481_v43  ;;  %v479_v45 = vld [vmem:[%s811_s6 + $0x60] sm:$0xff]  ;;  %v476_v50 = vld [vmem:[%s811_s6 + $0x48] sm:$0xff]  ;;  %v474_v54 = vld [vmem:[%s811_s6 + $0x38] sm:$0xff] }
  0x14   : > { %407 = vmatpush.msra.mxu0 %v394_v15  ;;  %v603_v46 = vld [vmem:[%s810_s5] ss:$0 sm:$0xff]  ;;  %v473_v56 = vld [vmem:[%s811_s6 + $0x30] sm:$0xff]  ;;  %v472_v58 = vld [vmem:[%s811_s6 + $0x28] sm:$0xff] }
  0x15   : > { %489 = vmatpush.msra.mxu1 %v480_v44  ;;  %v475_v52 = vld [vmem:[%s811_s6 + $0x40] sm:$0xff]  ;;  %v470_v0 = vld [vmem:[%s811_s6 + $0x18] sm:$0xff]  ;;  %v468_v6 = vld [vmem:[%s811_s6 + $0x8] sm:$0xff] }
  0x16   : > { %408 = vmatpush.msra.mxu0 %v393_v16  ;;  %v471_v61 = vld [vmem:[%s811_s6 + $0x20] sm:$0xff] }
  0x17   : > { %490 = vmatpush.msra.mxu1 %v479_v45 }
  0x18   : > { %409 = vmatpush.msra.mxu0 %v392_v17 }
  0x19   : > { %491 = vmatpush.msra.mxu1 %v478_v47 }
  0x1a   : > { %410 = vmatpush.msra.mxu0 %v391_v18 }
  0x1b   : > { %492 = vmatpush.msra.mxu1 %v477_v48 }
  0x1c   : > { %411 = vmatpush.msra.mxu0 %v390_v19 }
  0x1d   : > { %493 = vmatpush.msra.mxu1 %v476_v50 }
  0x1e   : > { %412 = vmatpush.msra.mxu0 %v389_v20 }
  0x1f   : > { %494 = vmatpush.msra.mxu1 %v475_v52 }
  0x20   : > { %413 = vmatpush.msra.mxu0 %v388_v21 }
  0x21   : > { %495 = vmatpush.msra.mxu1 %v474_v54 }
  0x22   : > { %414 = vmatpush.msra.mxu0 %v387_v22 }
  0x23   : > { %496 = vmatpush.msra.mxu1 %v473_v56 }
  0x24   : > { %415 = vmatpush.msra.mxu0 %v386_v23 }
  0x25   : > { %497 = vmatpush.msra.mxu1 %v472_v58 }
  0x26   : > { %416 = vmatpush.msra.mxu0 %v385_v24 }
  0x27   : > { %498 = vmatpush.msra.mxu1 %v471_v61 }
  0x28   : > { %417 = vmatpush.msra.mxu0 %v384_v25 }
  0x29   : > { %499 = vmatpush.msra.mxu1 %v470_v0 }
  0x2a   : > { %418 = vmatpush.msra.mxu0 %v383_v26 }
  0x86   : > { %v353_v8 = vpop.xlane.xlu0 %352 }
  0x87   : > { %v354_v9 = vmul.f32 0.125, %v353_v8  ;;  %v467_v8 = vld [vmem:[%s811_s6] sm:$0xff] }
  0x89   : > { %v355_v10 = vsub.f32 %v345_v4, %v354_v9 }
  0x8b   : > { %v356_v11 = vmul.f32 %v588_v3, %v355_v10  ;;  %v469_v3 = vld [vmem:[%s811_s6 + $0x10] sm:$0xff] }
  0x8c   : > { %500 = vmatpush.msra.mxu1 %v469_v3 }
  0x8d   : > { %v357_v12 = vmul.f32 %v356_v11, %v356_v11 }
  0x8e   : > { %501 = vmatpush.msra.mxu1 %v468_v6 }
  0x8f   : > { %358 = vadd.xlane.f32.xlu0 %v357_v12 }
  0x90   : > { %502 = vmatpush.msra.mxu1 %v467_v8 }
 0x102   : > { %v359_v27 = vpop.xlane.xlu0 %358 }
 0x103   : > { %v360_v28 = vmul.f32 0.125, %v359_v27 }
 0x105   : > { %v361_v29 = vadd.f32 1e-05, %v360_v28 }
 0x107   : > { %606 = vrsqrt.f32 %v361_v29  ;;  %vm368_vm2 = vweird.f32 %v361_v29 }
 0x10d   : > { %v607_v30 = vpop.eup %606 }
 0x10e   : > { %v363_v31 = vmul.f32 %v607_v30, %v361_v29  ;;  %vm369_vm1 = vweird.f32 %v607_v30 }
 0x10f   : > { %vm370_vm3 = vmor %vm368_vm2, %vm369_vm1 }
 0x110   : > { %v364_v32 = vmul.f32 %v607_v30, %v363_v31 }
 0x112   : > { %v365_v33 = vmul.f32 0.5, %v364_v32 }
 0x114   : > { %v366_v34 = vsub.f32 1.5, %v365_v33 }
 0x116   : > { %v367_v35 = vmul.f32 %v607_v30, %v366_v34 }
 0x118   : > { %v371_v37 = vsel %vm370_vm3, %v607_v30, %v367_v35 }
 0x119   : > { %v372_v38 = vmul.f32 %v371_v37, %v356_v11  ;;  %v605_v37 = vld [vmem:[%s813_s8] ss:$0 sm:$0xff] }
 0x11b   : > { %v377_v40 = vmul.f32 %v601_v36, %v372_v38  ;;  %v604_v36 = vld [vmem:[%s812_s7] ss:$0 sm:$0xff] }
 0x11d   : > { %v382_v41 = vadd.f32 %v602_v39, %v377_v40  ;;  %v512_v40 = vld [vmem:[%s340_s13] sm:$0xff] }
 0x11f   : > { %419 = vmatmul.f32.vlgmr.msra.gmra.mxu0 %v382_v41 }
 0x19c   : > { %v420_v49 = vpop.f32.mrf.mxu0 }
 0x19d   : > { %v421_v51 = vadd.f32 %v603_v46, %v420_v49 }
 0x19f   : > { %v424_v53 = vmul.f32 0.70710677, %v421_v51  ;;  %v423_v33 = vmul.f32 0.5, %v421_v51 }
 0x1a1   : > { %v425_v55 = vmul.f32 %v424_v53, %v424_v53 }
 0x1a3   : > { %v426_v57 = vmin.f32 %v425_v55, 16.0 }
 0x1a5   : > { %v427_v59 = vmul.f32 2.1237322e-06, %v426_v57  ;;  %v438_v60 = vmul.f32 3.8918573e-05, %v426_v57 }
 0x1a7   : > { %v428_v62 = vadd.f32 0.00028619796, %v427_v59  ;;  %v439_v63 = vadd.f32 0.001143296, %v438_v60 }
 0x1a9   : > { %v429_v1 = vmul.f32 %v428_v62, %v426_v57  ;;  %v440_v2 = vmul.f32 %v439_v63, %v426_v57 }
 0x1ab   : > { %v441_v4 = vadd.f32 0.014752088, %v440_v2  ;;  %v430_v5 = vadd.f32 0.0036580483, %v429_v1 }
 0x1ad   : > { %v442_v7 = vmul.f32 %v441_v4, %v426_v57  ;;  %v431_v10 = vmul.f32 %v430_v5, %v426_v57 }
 0x1af   : > { %v443_v9 = vadd.f32 0.112945676, %v442_v7  ;;  %v432_v13 = vadd.f32 0.05243302, %v431_v10 }
 0x1b1   : > { %v444_v11 = vmul.f32 %v443_v9, %v426_v57  ;;  %v433_v16 = vmul.f32 %v432_v13, %v426_v57 }
 0x1b3   : > { %v445_v12 = vadd.f32 0.4994258, %v444_v11  ;;  %v434_v17 = vadd.f32 0.18741608, %v433_v16 }
 0x1b5   : > { %v446_v14 = vmul.f32 %v445_v12, %v426_v57  ;;  %v435_v19 = vmul.f32 %v434_v17, %v426_v57 }
 0x1b7   : > { %v447_v15 = vadd.f32 1.0, %v446_v14  ;;  %v436_v23 = vadd.f32 1.1283791, %v435_v19 }
 0x1b9   : > { %608 = vrcp.f32 %v447_v15  ;;  %v459_v22 = vand.u32 2147483648, %v447_v15  ;;  %v457_v25 = vand.u32 2147483647, %v447_v15  ;;  %vm453_vm5 = vweird.f32 %v447_v15 }
 0x1ba   : > { %v437_v28 = vmul.f32 %v436_v23, %v424_v53 }
 0x1bb   : > { %v460_v27 = vor.u32 1.1754944e-38, %v459_v22  ;;  %vm458_vm7 = vcmp.eq.f32.partialorder %v457_v25, 8.507059e+37 }
 0x1bf   : > { %v609_v18 = vpop.eup %608 }
 0x1c0   : > { %v449_v20 = vmul.f32 %v609_v18, %v447_v15  ;;  %vm454_vm4 = vweird.f32 %v609_v18 }
 0x1c1   : > { %vm455_vm6 = vmor %vm453_vm5, %vm454_vm4 }
 0x1c2   : > { %v450_v21 = vsub.f32 1.0, %v449_v20 }
 0x1c4   : > { %v451_v24 = vmul.f32 %v609_v18, %v450_v21 }
 0x1c6   : > { %v452_v26 = vadd.f32 %v609_v18, %v451_v24 }
 0x1c8   : > { %v456_v29 = vsel %vm455_vm6, %v609_v18, %v452_v26 }
 0x1c9   : > { %v461_v30 = vsel %vm458_vm7, %v460_v27, %v456_v29 }
 0x1ca   : > { %v462_v31 = vmul.f32 %v461_v30, %v437_v28 }
 0x1cc   : > { %v589_v32 = vclamps-f32 %v462_v31, 1.0 }
 0x1ce   : > { %v465_v34 = vadd.f32 1.0, %v589_v32 }
 0x1d0   : > { %v466_v35 = vmul.f32 %v465_v34, %v423_v33 }
 0x1d2   : > { %503 = vmatmul.f32.vlgmr.msra.gmra.mxu1 %v466_v35 }
 0x24f   : > { %v504_v38 = vpop.f32.mrf.mxu1 }
 0x250   : > { %v505_v39 = vadd.f32 %v604_v36, %v504_v38 }
 0x252   : > { %v511_v41 = vmul.f32 %v605_v37, %v505_v39 }
 0x254   : > { %v513_v42 = vadd.f32 %v512_v40, %v511_v41 }
 0x256   : > { %514 = vst [vmem:[%s344_s18] sm:$0xff] %v513_v42 }
 0x257 PF: > { %s19_s30 = sadd.s32 1, %s616_s30  }
 0x258   : > { %p16_p4 = scmp.ge.s32.totalorder %s19_s30, 4  }
 0x25a   :  { %18 = sbr.rel (!%p16_p4) target bundleno = 1 (0x1), region = 89 }

// kernel: convnext_forward.2
= control target key start
LH: loop header
LB: loop body
LE: loop exit
PB: predicated region body
PF: predicated region fallthrough
CT: control target
= control target key end

     0   :  { %s626_s30 = smov [#allocation4]   ;;  %s627_s8 = smov [#allocation5]   ;;  %s946_s0 = inlined_call_operand.vmem [shape: s32[32], index: 0, kind: input, shape index: {}]   ;;  %s947_s2 = inlined_call_operand.vmem [shape: f32[16,128], index: 2, kind: input, shape index: {}]   ;;  %s948_s3 = inlined_call_operand.vmem [shape: f32[32,4], index: 3, kind: input, shape index: {}]   ;;  %s949_s4 = inlined_call_operand.vmem [shape: f32[4,128], index: 4, kind: input, shape index: {}]   ;;  %s950_s5 = inlined_call_operand.vmem [shape: f32[1,128], index: 5, kind: input, shape index: {}]   ;;  %s951_s6 = inlined_call_operand.vmem [shape: f32[32,128], index: 6, kind: output, shape index: {0}]   ;;  %s952_s7 = inlined_call_operand.vmem [shape: f32[16,128], index: 7, kind: output, shape index: {1}]   ;;  %s953_s1 = inlined_call_operand.vmem [shape: s32[32], index: 1, kind: input, shape index: {}]  }
   0x1   :  { %967 = sst [smem:[#allocation7_spill]] %s948_s3  ;;  %s14_s26 = sshll.u32 %s946_s0, 4  ;;  %s15_s26 = int_to_ptr.vmem [resolvable:$true] %s14_s26 }
   0x2   :  { %s19_s29 = sshll.u32 %s953_s1, 4  ;;  %s20_s29 = int_to_ptr.vmem [resolvable:$true] %s19_s29 }
   0x3   :  { %17 = dma.vmem_to_smem %s15_s26, 16, %s626_s30, [#allocation3] }
   0x4   :  { %22 = dma.vmem_to_smem %s20_s29, 16, %s627_s8, [#allocation3] }
   0x5   :  { %620 = dma.done.wait [#allocation3], 32 }
   0x6   :  { %621 = vsyncadd [#allocation3], 4294967264 }
   0x7   :  { %25 = sfence }
   0x8   :  { %s674_s9 = smov 0  }
   0x9 LB: > { %s564_s0 = sadd.s32 4294967295, %s624_s9   ;;  %p568_p0 = scmp.ge.s32.totalorder %s624_s9, 1  ;;  %s624_s9 = sphi %s674_s9, %s31_s9  }
   0xa   : > { %p201_p1 = scmp.lt.s32.totalorder %s624_s9, 3 }
   0xc   : > { %p202_p2 = pnand %p568_p0, %p201_p1 }
   0xd   : > { %s569_s1 = sshll.u32 (!%p202_p2), %s564_s0, 1  ;;  %s682_s10 = sshll.u32 (!%p202_p2), %s564_s0, 4 }
   0xe   : > { %205 = sbr.rel (%p202_p2) target bundleno = 318 (0x13e), region = 36  ;;  %p230_p3 = scmp.lt.s32.totalorder (!%p202_p2), %s569_s1, 3 }
   0xf   : > { %s968_s3 = sld [smem:[#allocation7_spill]] (!%p202_p2)  ;;  %p574_p4 = scmp.ne.s32.totalorder (!%p202_p2), %s564_s0, 0 }
  0x13   : > { %s985_s1 = smov (!%p230_p3, %s569_s1), 3  ;;  %245 = sbr.rel (%p574_p4) target bundleno = 27 (0x1b), region = 40 }
  0x14   : > { %s570_s11 = sshll.u32 %s985_s1, 3 }
  0x15   : > { %s233_s14 = scalar_lea.vmem %s968_s3, %s570_s11  ;;  %s690_s17 = scalar_lea.vmem %s951_s6, %s570_s11 }
  0x18   : > { %v591_v0 = vld [vmem:[%s950_s5] ss:$0 sm:$0xff] }
  0x19   : > { %250 = vst [vmem:[%s952_s7] sm:$0xff] %v591_v0 }
  0x1a   : > { %251 = vst [vmem:[%s952_s7 + $0x8] sm:$0xff] %v591_v0 }
  0x1b PF: > { %v254_v1 = vld [vmem:[%s949_s4] sm:$0xf]  ;;  %vm262_vm0 = vcmask 1043456   ;;  %vm255_vm1 = vcmask 31744   ;;  %v253_v3 = vld [vmem:[%s233_s14 + $0x8] sm:$0xff]  ;;  %s960_s26 = sadd.s32 1, %s682_s10 }
  0x1c   : > { %v252_v2 = vld [vmem:[%s233_s14] sm:$0xff]  ;;  %575 = vmatpush.msk.msra.mxu0 %vm262_vm0, %v254_v1  ;;  %580 = vmatpush.msk.msra.mxu1 %vm262_vm0, %v254_v1  ;;  %s959_s27 = sadd.s32 2, %s682_s10  ;;  %s707_s28 = sld [smem:[#allocation4 + %s682_s10]] }
  0x1d   : > { %576 = vmatmul.msk.f32.vlgmr.msra.gmra.mxu0 %vm255_vm1, %v252_v2  ;;  %577 = vmatmul.msk.f32.vlgmr.msra.gmra.mxu1 %vm255_vm1, %v253_v3  ;;  %s711_s29 = sld [smem:[#allocation4 + %s960_s26]]  ;;  %s957_s30 = sadd.s32 3, %s682_s10 }
  0x1e   : > { %s716_s8 = sld [smem:[#allocation4 + %s959_s27]]  ;;  %s955_s0 = sadd.s32 4, %s682_s10 }
  0x1f   : > { %s721_s1 = sld [smem:[#allocation4 + %s957_s30]]  ;;  %s954_s11 = sadd.s32 5, %s682_s10 }
  0x20   : > { %s726_s12 = sld [smem:[#allocation4 + %s955_s0]]  ;;  %s956_s13 = sadd.s32 6, %s682_s10 }
  0x21   : > { %s731_s14 = sld [smem:[#allocation4 + %s954_s11]]  ;;  %s958_s19 = sadd.s32 7, %s682_s10 }
  0x22   : > { %s290_s18 = scalar_lea.vmem %s947_s2, %s707_s28  ;;  %s744_s23 = sld [smem:[#allocation4 + %s956_s13]] }
  0x23   : > { %s295_s22 = scalar_lea.vmem %s947_s2, %s711_s29  ;;  %s962_s15 = sadd.s32 8, %s682_s10  ;;  %v291_v4 = vld [vmem:[%s290_s18] sm:$0x1] }
  0x24   : > { %s300_s11 = scalar_lea.vmem %s947_s2, %s716_s8  ;;  %s753_s28 = sld [smem:[#allocation4 + %s958_s19]]  ;;  %v296_v5 = vld [vmem:[%s295_s22] sm:$0x1]  ;;  %292 = vst [vmem:[#allocation2] sm:$0x1] %v291_v4 }
  0x25   : > { %s961_s16 = sadd.s32 9, %s682_s10  ;;  %s305_s29 = scalar_lea.vmem %s947_s2, %s721_s1  ;;  %v301_v6 = vld [vmem:[%s300_s11] sm:$0x1]  ;;  %297 = vst [vmem:[#allocation2 + $0x1] sm:$0x1] %v296_v5 }
  0x26   : > { %s963_s21 = sadd.s32 10, %s682_s10  ;;  %s763_s13 = sld [smem:[#allocation4 + %s962_s15]]  ;;  %v306_v7 = vld [vmem:[%s305_s29] sm:$0x1]  ;;  %302 = vst [vmem:[#allocation2 + $0x2] sm:$0x1] %v301_v6 }
  0x27   : > { %s964_s30 = sadd.s32 11, %s682_s10  ;;  %s768_s24 = sld [smem:[#allocation4 + %s961_s16]]  ;;  %307 = vst [vmem:[#allocation2 + $0x3] sm:$0x1] %v306_v7 }
  0x28   : > { %s965_s8 = sadd.s32 12, %s682_s10  ;;  %s773_s25 = sld [smem:[#allocation4 + %s963_s21]] }
  0x29   : > { %s966_s19 = sadd.s32 13, %s682_s10  ;;  %s310_s0 = scalar_lea.vmem %s947_s2, %s726_s12 }
  0x2a   : > { %s782_s1 = sld [smem:[#allocation4 + %s964_s30]]  ;;  %s363_s21 = sadd.s32 15, %s682_s10  ;;  %v311_v8 = vld [vmem:[%s310_s0] sm:$0x1] }
  0x2b   : > { %s786_s20 = sld [smem:[#allocation4 + %s965_s8]]  ;;  %s315_s12 = scalar_lea.vmem %s947_s2, %s731_s14  ;;  %312 = vst [vmem:[#allocation2 + $0x4] sm:$0x1] %v311_v8 }
  0x2c   : > { %s791_s15 = sld [smem:[#allocation4 + %s966_s19]]  ;;  %s320_s16 = scalar_lea.vmem %s947_s2, %s744_s23  ;;  %v316_v9 = vld [vmem:[%s315_s12] sm:$0x1] }
  0x2d   : > { %s969_s3 = sadd.s32 14, %s682_s10  ;;  %s325_s11 = scalar_lea.vmem %s947_s2, %s753_s28  ;;  %v321_v10 = vld [vmem:[%s320_s16] sm:$0x1]  ;;  %317 = vst [vmem:[#allocation2 + $0x5] sm:$0x1] %v316_v9 }
  0x2e   : > { %s804_s19 = sld [smem:[#allocation4 + %s969_s3]]  ;;  %s330_s30 = scalar_lea.vmem %s947_s2, %s763_s13  ;;  %v326_v11 = vld [vmem:[%s325_s11] sm:$0x1]  ;;  %322 = vst [vmem:[#allocation2 + $0x6] sm:$0x1] %v321_v10 }
  0x2f   : > { %s812_s14 = sld [smem:[#allocation4 + %s363_s21]]  ;;  %s335_s8 = scalar_lea.vmem %s947_s2, %s768_s24  ;;  %v331_v12 = vld [vmem:[%s330_s30] sm:$0x1]  ;;  %327 = vst [vmem:[#allocation2 + $0x7] sm:$0x1] %v326_v11 }
  0x30   : > { %s340_s27 = scalar_lea.vmem %s947_s2, %s773_s25  ;;  %s345_s13 = scalar_lea.vmem %s947_s2, %s782_s1  ;;  %v336_v13 = vld [vmem:[%s335_s8] sm:$0x1]  ;;  %332 = vst [vmem:[#allocation2 + $0x8] sm:$0x1] %v331_v12 }
  0x31   : > { %s350_s29 = scalar_lea.vmem %s947_s2, %s786_s20  ;;  %v341_v14 = vld [vmem:[%s340_s27] sm:$0x1]  ;;  %337 = vst [vmem:[#allocation2 + $0x9] sm:$0x1] %v336_v13  ;;  %s970_s28 = sadd.s32 1, %s682_s10 }
  0x32   : > { %s355_s26 = scalar_lea.vmem %s947_s2, %s791_s15  ;;  %v346_v15 = vld [vmem:[%s345_s13] sm:$0x1]  ;;  %342 = vst [vmem:[#allocation2 + $0xa] sm:$0x1] %v341_v14  ;;  %s380_s0 = sld [smem:[#allocation5 + %s970_s28]] }
  0x33   : > { %v351_v16 = vld [vmem:[%s350_s29] sm:$0x1]  ;;  %347 = vst [vmem:[#allocation2 + $0xb] sm:$0x1] %v346_v15  ;;  %s971_s13 = sadd.s32 2, %s682_s10  ;;  %s972_s11 = sadd.s32 3, %s682_s10 }
  0x34   : > { %s360_s3 = scalar_lea.vmem %s947_s2, %s804_s19  ;;  %v356_v17 = vld [vmem:[%s355_s26] sm:$0x1]  ;;  %352 = vst [vmem:[#allocation2 + $0xc] sm:$0x1] %v351_v16  ;;  %s374_s19 = sld [smem:[#allocation5 + %s682_s10]] }
  0x35   : > { %s365_s8 = scalar_lea.vmem %s947_s2, %s812_s14  ;;  %v361_v18 = vld [vmem:[%s360_s3] sm:$0x1]  ;;  %357 = vst [vmem:[#allocation2 + $0xd] sm:$0x1] %v356_v17  ;;  %s386_s16 = sld [smem:[#allocation5 + %s971_s13]] }
  0x36   : > { %v366_v19 = vld [vmem:[%s365_s8] sm:$0x1]  ;;  %362 = vst [vmem:[#allocation2 + $0xe] sm:$0x1] %v361_v18  ;;  %s392_s26 = sld [smem:[#allocation5 + %s972_s11]]  ;;  %s973_s1 = sadd.s32 4, %s682_s10 }
  0x37   : > { %367 = vst [vmem:[#allocation2 + $0xf] sm:$0x1] %v366_v19  ;;  %v368_v20 = vld [vmem:[#allocation2] sm:$0xff]  ;;  %s398_s23 = sld [smem:[#allocation5 + %s973_s1]]  ;;  %s974_s20 = sadd.s32 5, %s682_s10 }
  0x38   : > { %s381_s18 = scalar_lea.vmem %s952_s7, %s380_s0  ;;  %s975_s12 = sadd.s32 6, %s682_s10 }
  0x39   : > { %s976_s29 = sadd.s32 7, %s682_s10  ;;  %s977_s30 = sadd.s32 8, %s682_s10 }
  0x3a   : > { %s375_s14 = scalar_lea.vmem %s952_s7, %s374_s19  ;;  %s978_s19 = sadd.s32 9, %s682_s10 }
  0x3b   : > { %v376_v26 = vld [vmem:[%s375_s14] sm:$0x1]  ;;  %s387_s24 = scalar_lea.vmem %s952_s7, %s386_s16  ;;  %s979_s0 = sadd.s32 10, %s682_s10 }
  0x3c   : > { %s393_s3 = scalar_lea.vmem %s952_s7, %s392_s26  ;;  %s980_s16 = sadd.s32 11, %s682_s10 }
  0x3d   : > { %s399_s15 = scalar_lea.vmem %s952_s7, %s398_s23  ;;  %s981_s26 = sadd.s32 12, %s682_s10 }
  0x3e   : > { %v369_v21 = vld [vmem:[#allocation2 + $0x8] sm:$0xff]  ;;  %s982_s23 = sadd.s32 13, %s682_s10 }
  0x9a   : > { %v283_v22 = vpop.f32.mrf.mxu0  ;;  %v286_v23 = vpop.f32.mrf.mxu1 }
  0x9b   : > { %v370_v24 = vmul.f32 %v368_v20, %v283_v22  ;;  %v371_v25 = vmul.f32 %v369_v21, %v286_v23 }
  0x9d   : > { %372 = vst [vmem:[%s690_s17] sm:$0xff] %v370_v24 }
  0x9e   : > { %373 = vst [vmem:[%s690_s17 + $0x8] sm:$0xff] %v371_v25 }
  0xa4   : > { %v377_v27 = vld [vmem:[%s690_s17] sm:$0x1]  ;;  %v383_v30 = vld [vmem:[%s690_s17 + $0x1] sm:$0x1]  ;;  %v389_v33 = vld [vmem:[%s690_s17 + $0x2] sm:$0x1] }
  0xa5   : > { %v378_v28 = vadd.f32 %v377_v27, %v376_v26  ;;  %v395_v36 = vld [vmem:[%s690_s17 + $0x3] sm:$0x1]  ;;  %v401_v39 = vld [vmem:[%s690_s17 + $0x4] sm:$0x1]  ;;  %v407_v42 = vld [vmem:[%s690_s17 + $0x5] sm:$0x1] }
  0xa6   : > { %v413_v45 = vld [vmem:[%s690_s17 + $0x6] sm:$0x1]  ;;  %v419_v48 = vld [vmem:[%s690_s17 + $0x7] sm:$0x1]  ;;  %v425_v51 = vld [vmem:[%s690_s17 + $0x8] sm:$0x1] }
  0xa7   : > { %379 = vst [vmem:[%s375_s14] sm:$0x1] %v378_v28  ;;  %s404_s14 = sld [smem:[#allocation5 + %s974_s20]]  ;;  %v431_v54 = vld [vmem:[%s690_s17 + $0x9] sm:$0x1]  ;;  %v437_v57 = vld [vmem:[%s690_s17 + $0xa] sm:$0x1] }
  0xa8   : > { %v443_v60 = vld [vmem:[%s690_s17 + $0xb] sm:$0x1]  ;;  %v449_v63 = vld [vmem:[%s690_s17 + $0xc] sm:$0x1]  ;;  %v455_v2 = vld [vmem:[%s690_s17 + $0xd] sm:$0x1] }
  0xa9   : > { %v461_v5 = vld [vmem:[%s690_s17 + $0xe] sm:$0x1]  ;;  %v467_v8 = vld [vmem:[%s690_s17 + $0xf] sm:$0x1] }
  0xad   : > { %s405_s27 = scalar_lea.vmem %s952_s7, %s404_s14  ;;  %s983_s14 = sadd.s32 14, %s682_s10 }
  0xae   : > { %v382_v29 = vld [vmem:[%s381_s18] sm:$0x1] }
  0xaf   : > { %v384_v31 = vadd.f32 %v383_v30, %v382_v29 }
  0xb1   : > { %385 = vst [vmem:[%s381_s18] sm:$0x1] %v384_v31  ;;  %s410_s18 = sld [smem:[#allocation5 + %s975_s12]] }
  0xb7   : > { %s411_s22 = scalar_lea.vmem %s952_s7, %s410_s18  ;;  %s464_s18 = sld [smem:[#allocation5 + %s363_s21]] }
  0xb8   : > { %v388_v32 = vld [vmem:[%s387_s24] sm:$0x1] }
  0xb9   : > { %v390_v34 = vadd.f32 %v389_v33, %v388_v32 }
  0xbb   : > { %391 = vst [vmem:[%s387_s24] sm:$0x1] %v390_v34  ;;  %s416_s24 = sld [smem:[#allocation5 + %s976_s29]] }
  0xc1   : > { %s417_s25 = scalar_lea.vmem %s952_s7, %s416_s24 }
  0xc2   : > { %v394_v35 = vld [vmem:[%s393_s3] sm:$0x1] }
  0xc3   : > { %v396_v37 = vadd.f32 %v395_v36, %v394_v35 }
  0xc5   : > { %397 = vst [vmem:[%s393_s3] sm:$0x1] %v396_v37  ;;  %s422_s3 = sld [smem:[#allocation5 + %s977_s30]] }
  0xcb   : > { %s423_s8 = scalar_lea.vmem %s952_s7, %s422_s3 }
  0xcc   : > { %v400_v38 = vld [vmem:[%s399_s15] sm:$0x1] }
  0xcd   : > { %v402_v40 = vadd.f32 %v401_v39, %v400_v38 }
  0xcf   : > { %403 = vst [vmem:[%s399_s15] sm:$0x1] %v402_v40  ;;  %s428_s15 = sld [smem:[#allocation5 + %s978_s19]] }
  0xd5   : > { %s429_s28 = scalar_lea.vmem %s952_s7, %s428_s15 }
  0xd6   : > { %v406_v41 = vld [vmem:[%s405_s27] sm:$0x1] }
  0xd7   : > { %v408_v43 = vadd.f32 %v407_v42, %v406_v41 }
  0xd9   : > { %409 = vst [vmem:[%s405_s27] sm:$0x1] %v408_v43  ;;  %s434_s27 = sld [smem:[#allocation5 + %s979_s0]] }
  0xdf   : > { %s435_s13 = scalar_lea.vmem %s952_s7, %s434_s27 }
  0xe0   : > { %v412_v44 = vld [vmem:[%s411_s22] sm:$0x1] }
  0xe1   : > { %v414_v46 = vadd.f32 %v413_v45, %v412_v44 }
  0xe3   : > { %415 = vst [vmem:[%s411_s22] sm:$0x1] %v414_v46  ;;  %s440_s22 = sld [smem:[#allocation5 + %s980_s16]] }
  0xe9   : > { %s441_s11 = scalar_lea.vmem %s952_s7, %s440_s22  ;;  %s465_s22 = scalar_lea.vmem %s952_s7, %s464_s18 }
  0xea   : > { %v418_v47 = vld [vmem:[%s417_s25] sm:$0x1] }
  0xeb   : > { %v420_v49 = vadd.f32 %v419_v48, %v418_v47 }
  0xed   : > { %421 = vst [vmem:[%s417_s25] sm:$0x1] %v420_v49  ;;  %s446_s25 = sld [smem:[#allocation5 + %s981_s26]] }
  0xf3   : > { %s447_s1 = scalar_lea.vmem %s952_s7, %s446_s25 }
  0xf4   : > { %v424_v50 = vld [vmem:[%s423_s8] sm:$0x1] }
  0xf5   : > { %v426_v52 = vadd.f32 %v425_v51, %v424_v50 }
  0xf7   : > { %427 = vst [vmem:[%s423_s8] sm:$0x1] %v426_v52  ;;  %s452_s8 = sld [smem:[#allocation5 + %s982_s23]] }
  0xfd   : > { %s453_s20 = scalar_lea.vmem %s952_s7, %s452_s8 }
  0xfe   : > { %v430_v53 = vld [vmem:[%s429_s28] sm:$0x1] }
  0xff   : > { %v432_v55 = vadd.f32 %v431_v54, %v430_v53 }
 0x101   : > { %433 = vst [vmem:[%s429_s28] sm:$0x1] %v432_v55  ;;  %s458_s28 = sld [smem:[#allocation5 + %s983_s14]] }
 0x107   : > { %s459_s12 = scalar_lea.vmem %s952_s7, %s458_s28 }
 0x108   : > { %v436_v56 = vld [vmem:[%s435_s13] sm:$0x1] }
 0x109   : > { %v438_v58 = vadd.f32 %v437_v57, %v436_v56 }
 0x10b   : > { %439 = vst [vmem:[%s435_s13] sm:$0x1] %v438_v58 }
 0x112   : > { %v442_v59 = vld [vmem:[%s441_s11] sm:$0x1] }
 0x113   : > { %v444_v61 = vadd.f32 %v443_v60, %v442_v59 }
 0x115   : > { %445 = vst [vmem:[%s441_s11] sm:$0x1] %v444_v61 }
 0x11c   : > { %v448_v62 = vld [vmem:[%s447_s1] sm:$0x1] }
 0x11d   : > { %v450_v0 = vadd.f32 %v449_v63, %v448_v62 }
 0x11f   : > { %451 = vst [vmem:[%s447_s1] sm:$0x1] %v450_v0 }
 0x126   : > { %v454_v1 = vld [vmem:[%s453_s20] sm:$0x1] }
 0x127   : > { %v456_v3 = vadd.f32 %v455_v2, %v454_v1 }
 0x129   : > { %457 = vst [vmem:[%s453_s20] sm:$0x1] %v456_v3 }
 0x130   : > { %v460_v4 = vld [vmem:[%s459_s12] sm:$0x1] }
 0x131   : > { %v462_v6 = vadd.f32 %v461_v5, %v460_v4 }
 0x133   : > { %463 = vst [vmem:[%s459_s12] sm:$0x1] %v462_v6 }
 0x13a   : > { %v466_v7 = vld [vmem:[%s465_s22] sm:$0x1] }
 0x13b   : > { %v468_v9 = vadd.f32 %v467_v8, %v466_v7 }
 0x13d   : > { %469 = vst [vmem:[%s465_s22] sm:$0x1] %v468_v9 }
 0x13e PF: > { %s31_s9 = sadd.s32 1, %s624_s9  }
 0x13f   : > { %p28_p5 = scmp.ge.s32.totalorder %s31_s9, 4  }
 0x141   :  { %30 = sbr.rel (!%p28_p5) target bundleno = 9 (0x9), region = 110 }

</bundles_post_ra>
